<compile_context>
chip_gen: v6e
topology: v6e:2x2x1
jax: 0.10.0
libtpu: 0.0.40
codegen_flags: <defaults>
</compile_context>

<pallas_src>
import functools
import numpy as np

import jax
import jax.numpy as jnp
from jax.experimental import pallas as pl
from jax.experimental.pallas import tpu as pltpu

_HI = jax.lax.Precision.HIGHEST


def _round_up(x, m):
    return ((x + m - 1) // m) * m


def _largest_divisor_leq(n, cap):
    cap = max(1, min(cap, n))
    for d in range(cap, 0, -1):
        if n % d == 0:
            return d
    return 1


def _default_vmem_limit():
    # v5e/v6e: 128 MiB physical VMEM, v7x: 64 MiB.  Leave ~25% headroom for the compiler.
    try:
        cap = int(pltpu.get_tpu_info().vmem_capacity_bytes)
    except Exception:
        cap = 64 * 1024 * 1024
    return int(min(cap - cap // 4, 96 * 1024 * 1024))


def _gelu_tanh(x):
    # tanh-approx GELU: tanh uses the EUP slot; |err| vs exact erf GELU ~1e-3.
    c = 0.7978845608028654  # sqrt(2/pi)
    return 0.5 * x * (1.0 + jnp.tanh(c * (x + 0.044715 * x * x * x)))


# ----------------------------- fused Pallas kernel -----------------------------------
def _convnext_kernel(x_ref, top_ref, bot_ref, wc_ref, bc_ref, w1_ref, b1_ref,
                     w2_ref, b2_ref, g_ref, o_ref, patch_ref, *, th, w, cp, n_th):
    """One (batch, row-tile) step of the fused ConvNeXt block.

    x_ref   : (1, th, w+2, cp) f32   tile rows; W pre-padded by 1/side, C zero-padded to cp
    top_ref : (1, 1,  w+2, cp) f32   row above the tile (clamped fetch; masked at image top)
    bot_ref : (1, 1,  w+2, cp) f32   row below the tile (clamped fetch; masked at image bottom)
    wc_ref  : (9*cp, cp) bf16        3x3 conv weights, tap-major (dy*3+dx), (Cin, Cout)
    w1/w2   : (cp, cp) bf16          pwconv weights (in, out)
    patch_ref: (th*w, 9*cp) bf16     VMEM scratch — im2col patch for the single big-K dot
    o_ref   : (1, th, w, cp) f32
    """
    t = pl.program_id(1)
    m = th * w

    xm = x_ref[0]                                            # (th, w+2, cp)  f32
    top = jnp.where(t > 0, top_ref[0], 0.0)                  # (1,  w+2, cp)  masked 1-row halo
    bot = jnp.where(t < n_th - 1, bot_ref[0], 0.0)           # (1,  w+2, cp)

    # ---- im2col fill: 9 taps -> bf16 scratch columns, no concat / no extended tile ----
    for k in range(9):
        dy, dx = divmod(k, 3)
        c0 = k * cp
        if dy == 0:        # extended rows [0, th)  = [top, xm[0:th-1]]
            pieces = [(0, top)] + ([(w, xm[0:th - 1])] if th > 1 else [])
        elif dy == 1:      # extended rows [1, th+1) = xm
            pieces = [(0, xm)]
        else:              # extended rows [2, th+2) = [xm[1:th], bot]
            pieces = ([(0, xm[1:th])] if th > 1 else []) + [(m - w, bot)]
        for r0, src in pieces:
            rows = src.shape[0] * w
            patch_ref[r0:r0 + rows, c0:c0 + cp] = (
                src[:, dx:dx + w, :].reshape(rows, cp).astype(jnp.bfloat16))

    # ---- 3x3 conv as ONE K = 9*cp MXU dot (bf16 operands, f32 accumulate) ----
    y = jnp.dot(patch_ref[...], wc_ref[...],
                preferred_element_type=jnp.float32) + bc_ref[...]

    # ---- pwconv1 -> GELU -> pwconv2 -> layer scale (bf16 MXU ops, f32 elementwise) ----
    h = _gelu_tanh(jnp.dot(y.astype(jnp.bfloat16), w1_ref[...],
                           preferred_element_type=jnp.float32) + b1_ref[...])
    z = jnp.dot(h.astype(jnp.bfloat16), w2_ref[...],
                preferred_element_type=jnp.float32) + b2_ref[...]
    z = g_ref[...] * z

    # ---- residual add in (th, w, cp) shape; original x is the interior of the W-padded tile
    out = xm[:, 1:w + 1, :] + z.reshape(th, w, cp)
    o_ref[0] = out.astype(o_ref.dtype)


# ----------------------------- host-side packing & wrapper ---------------------------
def pack_params(p, cp):
    """Pad + reshape torch-layout params into kernel layout (channel dims -> cp, bf16 mats)."""
    c = p["conv_b"].shape[0]
    pc = cp - c
    # torch conv weight (Cout, Cin, kh, kw) -> (kh, kw, Cin, Cout) -> (9, Cin, Cout) -> (9*cp, cp)
    wc = jnp.transpose(p["conv_w"], (2, 3, 1, 0)).reshape(9, c, c)
    wc = jnp.pad(wc, ((0, 0), (0, pc), (0, pc))).reshape(9 * cp, cp)
    return dict(
        wc=wc.astype(jnp.bfloat16),
        bc=jnp.pad(p["conv_b"], (0, pc)).reshape(1, cp),
        w1=jnp.pad(p["w1"].T, ((0, pc), (0, pc))).astype(jnp.bfloat16),   # Linear (out,in) -> (in,out)
        b1=jnp.pad(p["b1"], (0, pc)).reshape(1, cp),
        w2=jnp.pad(p["w2"].T, ((0, pc), (0, pc))).astype(jnp.bfloat16),
        b2=jnp.pad(p["b2"], (0, pc)).reshape(1, cp),
        g=jnp.pad(p["gamma"], (0, pc)).reshape(1, cp),
    )


def convnext_block_pallas(x_nchw, params, block_h=64):
    """Fused ConvNeXtBlock forward.  x: (B, C, H, W) f32 -> (B, C, H, W) f32."""
    B, C, H, W = x_nchw.shape
    cp = _round_up(C, 128)                      # lane-dense channel padding
    th = _largest_divisor_leq(H, block_h)       # never collapses to one giant tile
    n_th = H // th

    kp = pack_params(params, cp)

    # NOTE: in a padded-NHWC network these transpose/pad/slice passes disappear (kept here
    # only so the public interface matches the (B, C, H, W) PyTorch module).
    x_nhwc = jnp.transpose(x_nchw, (0, 2, 3, 1))
    x_p = jnp.pad(x_nhwc, ((0, 0), (0, 0), (1, 1), (0, cp - C)))   # W conv halo + C pad

    flops = 2 * B * H * W * (9 * cp * cp + 2 * cp * cp)
    transcendentals = B * H * W * cp
    bytes_accessed = int((x_p.size + B * H * W * cp) * 4           # activations in + out
                         + (9 * cp * cp + 2 * cp * cp) * 2         # bf16 weight matrices
                         + 5 * cp * 4)                             # biases / gamma

    kernel = functools.partial(_convnext_kernel, th=th, w=W, cp=cp, n_th=n_th)
    const2 = lambda b, t: (0, 0)

    out = pl.pallas_call(
        kernel,
        grid=(B, n_th),
        in_specs=[
            pl.BlockSpec((1, th, W + 2, cp), lambda b, t: (b, t, 0, 0)),
            pl.BlockSpec((1, 1, W + 2, cp),
                         lambda b, t: (b, jnp.maximum(t * th - 1, 0), 0, 0)),
            pl.BlockSpec((1, 1, W + 2, cp),
                         lambda b, t: (b, jnp.minimum((t + 1) * th, H - 1), 0, 0)),
            pl.BlockSpec((9 * cp, cp), const2),
            pl.BlockSpec((1, cp), const2),
            pl.BlockSpec((cp, cp), const2),
            pl.BlockSpec((1, cp), const2),
            pl.BlockSpec((cp, cp), const2),
            pl.BlockSpec((1, cp), const2),
            pl.BlockSpec((1, cp), const2),
        ],
        out_specs=pl.BlockSpec((1, th, W, cp), lambda b, t: (b, t, 0, 0)),
        out_shape=jax.ShapeDtypeStruct((B, H, W, cp), x_nchw.dtype),
        scratch_shapes=[pltpu.VMEM((th * W, 9 * cp), jnp.bfloat16)],
        compiler_params=pltpu.CompilerParams(
            dimension_semantics=("parallel", "parallel"),
            vmem_limit_bytes=_default_vmem_limit()),
        cost_estimate=pl.CostEstimate(flops=flops,
                                      transcendentals=transcendentals,
                                      bytes_accessed=bytes_accessed),
    )(x_p, x_p, x_p, kp["wc"], kp["bc"], kp["w1"], kp["b1"],
      kp["w2"], kp["b2"], kp["g"])

    return jnp.transpose(out[..., :C], (0, 3, 1, 2))


# ----------------------------- pure-JAX reference (matches the PyTorch module) --------
def convnext_block_ref(x_nchw, p):
    y = jax.lax.conv_general_dilated(
        x_nchw, p["conv_w"], window_strides=(1, 1), padding=((1, 1), (1, 1)),
        dimension_numbers=("NCHW", "OIHW", "NCHW"), precision=_HI)
    y = y + p["conv_b"][None, :, None, None]
    y = jnp.transpose(y, (0, 2, 3, 1))                       # NCHW -> NHWC
    y = jnp.dot(y, p["w1"].T, precision=_HI) + p["b1"]
    y = jax.nn.gelu(y, approximate=False)                    # exact erf GELU == nn.GELU()
    y = jnp.dot(y, p["w2"].T, precision=_HI) + p["b2"]
    y = p["gamma"] * y
    y = jnp.transpose(y, (0, 3, 1, 2))                       # NHWC -> NCHW
    return x_nchw + y                                        # drop_path(p=0.0) == identity


# ----------------------------- deterministic parameter init ---------------------------
def init_params(key, dim):
    ks = jax.random.split(key, 7)

    def w(k, shape, fan_in):
        return jax.random.normal(k, shape, jnp.float32) / np.sqrt(fan_in)

    p = {}
    p["conv_w"] = w(ks[0], (dim, dim, 3, 3), 9 * dim)        # torch Conv2d (out, in, kh, kw)
    p["conv_b"] = 0.05 * jax.random.normal(ks[1], (dim,), jnp.float32)
    p["w1"] = w(ks[2], (dim, dim), dim)                      # torch Linear (out, in)
    p["b1"] = 0.05 * jax.random.normal(ks[3], (dim,), jnp.float32)
    p["w2"] = w(ks[4], (dim, dim), dim)
    p["b2"] = 0.05 * jax.random.normal(ks[5], (dim,), jnp.float32)
    # layer-scale gamma (module inits to 1e-6*ones); trained-like values exercise the path.
    p["gamma"] = 1.0 + 0.2 * jax.random.normal(ks[6], (dim,), jnp.float32)
    return p


# ----------------------------- main ----------------------------------------------------
if __name__ == "__main__":
    B, C, H, W = 2, 32, 16, 16
    key = jax.random.PRNGKey(0)
    kx, kpar = jax.random.split(key)
    x = jax.random.normal(kx, (B, C, H, W), jnp.float32)
    params = init_params(kpar, C)

    fwd_pallas = jax.jit(functools.partial(convnext_block_pallas, block_h=8))
    fwd_ref = jax.jit(convnext_block_ref)

    out = jax.block_until_ready(fwd_pallas(x, params))
    ref = jax.block_until_ready(fwd_ref(x, params))

    assert out.shape == (B, C, H, W) and out.dtype == jnp.float32
    err = float(jnp.max(jnp.abs(out - ref)))
    # tolerance sized for bf16 MXU operands (f32 accumulate) + tanh-GELU vs exact erf GELU
    assert err < 1e-1, f"Pallas vs reference mismatch: max abs err = {err}"
    print("KERNEL_OK")
</pallas_src>

<mosaic_0001>
module attributes {stable_mosaic.version = 11 : i64} {
  func.func @_convnext_kernel(%arg0: i32, %arg1: i32, %arg2: memref<1x8x18x128xf32, #tpu.memory_space<vmem>>, %arg3: memref<1x1x18x128xf32, #tpu.memory_space<vmem>>, %arg4: memref<1x1x18x128xf32, #tpu.memory_space<vmem>>, %arg5: memref<1152x128xbf16, #tpu.memory_space<vmem>>, %arg6: memref<1x128xf32, #tpu.memory_space<vmem>>, %arg7: memref<128x128xbf16, #tpu.memory_space<vmem>>, %arg8: memref<1x128xf32, #tpu.memory_space<vmem>>, %arg9: memref<128x128xbf16, #tpu.memory_space<vmem>>, %arg10: memref<1x128xf32, #tpu.memory_space<vmem>>, %arg11: memref<1x128xf32, #tpu.memory_space<vmem>>, %arg12: memref<1x8x16x128xf32, #tpu.memory_space<vmem>>, %arg13: memref<128x1152xbf16, #tpu.memory_space<vmem>>) attributes {dimension_semantics = [#tpu.dimension_semantics<parallel>, #tpu.dimension_semantics<parallel>], iteration_bounds = array<i64: 2, 2>, scalar_prefetch = 0 : i64, scratch_operands = 1 : i64, tpu.core_type = #tpu.core_type<tc>, window_params = [{transform_indices = @transform_0, window_bounds = array<i64: 1, 8, 18, 128>}, {transform_indices = @transform_1, window_bounds = array<i64: 1, 1, 18, 128>}, {transform_indices = @transform_2, window_bounds = array<i64: 1, 1, 18, 128>}, {pipeline_mode = #tpu.pipeline_mode<synchronous>, transform_indices = @transform_3, window_bounds = array<i64: 1152, 128>}, {pipeline_mode = #tpu.pipeline_mode<synchronous>, transform_indices = @transform_4, window_bounds = array<i64: 1, 128>}, {pipeline_mode = #tpu.pipeline_mode<synchronous>, transform_indices = @transform_5, window_bounds = array<i64: 128, 128>}, {pipeline_mode = #tpu.pipeline_mode<synchronous>, transform_indices = @transform_6, window_bounds = array<i64: 1, 128>}, {pipeline_mode = #tpu.pipeline_mode<synchronous>, transform_indices = @transform_7, window_bounds = array<i64: 128, 128>}, {pipeline_mode = #tpu.pipeline_mode<synchronous>, transform_indices = @transform_8, window_bounds = array<i64: 1, 128>}, {pipeline_mode = #tpu.pipeline_mode<synchronous>, transform_indices = @transform_9, window_bounds = array<i64: 1, 128>}, {transform_indices = @transform_10, window_bounds = array<i64: 1, 8, 16, 128>}]} {
    %c0 = arith.constant 0 : index
    %c0_0 = arith.constant 0 : index
    %c0_1 = arith.constant 0 : index
    %c0_2 = arith.constant 0 : index
    %0 = vector.load %arg2[%c0, %c0_0, %c0_1, %c0_2] : memref<1x8x18x128xf32, #tpu.memory_space<vmem>>, vector<1x8x18x128xf32>
    %1 = vector.shape_cast %0 : vector<1x8x18x128xf32> to vector<8x18x128xf32>
    %c0_i32 = arith.constant 0 : i32
    %2 = arith.cmpi sgt, %arg1, %c0_i32 : i32
    %c0_3 = arith.constant 0 : index
    %c0_4 = arith.constant 0 : index
    %c0_5 = arith.constant 0 : index
    %c0_6 = arith.constant 0 : index
    %3 = vector.load %arg3[%c0_3, %c0_4, %c0_5, %c0_6] : memref<1x1x18x128xf32, #tpu.memory_space<vmem>>, vector<1x1x18x128xf32>
    %4 = vector.shape_cast %3 : vector<1x1x18x128xf32> to vector<1x18x128xf32>
    %cst = arith.constant 0.000000e+00 : f32
    %5 = vector.broadcast %cst : f32 to vector<1x18x128xf32>
    %6 = arith.select %2, %4, %5 : vector<1x18x128xf32>
    %c1_i32 = arith.constant 1 : i32
    %7 = arith.cmpi slt, %arg1, %c1_i32 : i32
    %c0_7 = arith.constant 0 : index
    %c0_8 = arith.constant 0 : index
    %c0_9 = arith.constant 0 : index
    %c0_10 = arith.constant 0 : index
    %8 = vector.load %arg4[%c0_7, %c0_8, %c0_9, %c0_10] : memref<1x1x18x128xf32, #tpu.memory_space<vmem>>, vector<1x1x18x128xf32>
    %9 = vector.shape_cast %8 : vector<1x1x18x128xf32> to vector<1x18x128xf32>
    %cst_11 = arith.constant 0.000000e+00 : f32
    %10 = vector.broadcast %cst_11 : f32 to vector<1x18x128xf32>
    %11 = arith.select %7, %9, %10 : vector<1x18x128xf32>
    %12 = vector.extract_strided_slice %1 {offsets = [0, 0, 0], sizes = [7, 18, 128], strides = [1, 1, 1]} : vector<8x18x128xf32> to vector<7x18x128xf32>
    %13 = vector.extract_strided_slice %6 {offsets = [0, 0, 0], sizes = [1, 16, 128], strides = [1, 1, 1]} : vector<1x18x128xf32> to vector<1x16x128xf32>
    %14 = vector.shape_cast %13 : vector<1x16x128xf32> to vector<16x128xf32>
    %15 = arith.truncf %14 : vector<16x128xf32> to vector<16x128xbf16>
    %c0_12 = arith.constant 0 : index
    %c0_13 = arith.constant 0 : index
    %16 = vector.load %arg13[%c0_12, %c0_13] : memref<128x1152xbf16, #tpu.memory_space<vmem>>, vector<16x128xbf16>
    tpu.vector_store %arg13[%c0_12, %c0_13], %15 {strides = array<i32>} : memref<128x1152xbf16, #tpu.memory_space<vmem>>, vector<16x128xbf16>,
    %17 = vector.extract_strided_slice %12 {offsets = [0, 0, 0], sizes = [7, 16, 128], strides = [1, 1, 1]} : vector<7x18x128xf32> to vector<7x16x128xf32>
    %18 = vector.shape_cast %17 : vector<7x16x128xf32> to vector<112x128xf32>
    %19 = arith.truncf %18 : vector<112x128xf32> to vector<112x128xbf16>
    %c16 = arith.constant 16 : index
    %c0_14 = arith.constant 0 : index
    %20 = vector.load %arg13[%c16, %c0_14] : memref<128x1152xbf16, #tpu.memory_space<vmem>>, vector<112x128xbf16>
    tpu.vector_store %arg13[%c16, %c0_14], %19 {strides = array<i32>} : memref<128x1152xbf16, #tpu.memory_space<vmem>>, vector<112x128xbf16>,
    %21 = vector.extract_strided_slice %1 {offsets = [0, 0, 0], sizes = [7, 18, 128], strides = [1, 1, 1]} : vector<8x18x128xf32> to vector<7x18x128xf32>
    %22 = vector.extract_strided_slice %6 {offsets = [0, 1, 0], sizes = [1, 16, 128], strides = [1, 1, 1]} : vector<1x18x128xf32> to vector<1x16x128xf32>
    %23 = vector.shape_cast %22 : vector<1x16x128xf32> to vector<16x128xf32>
    %24 = arith.truncf %23 : vector<16x128xf32> to vector<16x128xbf16>
    %c0_15 = arith.constant 0 : index
    %c128 = arith.constant 128 : index
    %25 = vector.load %arg13[%c0_15, %c128] : memref<128x1152xbf16, #tpu.memory_space<vmem>>, vector<16x128xbf16>
    tpu.vector_store %arg13[%c0_15, %c128], %24 {strides = array<i32>} : memref<128x1152xbf16, #tpu.memory_space<vmem>>, vector<16x128xbf16>,
    %26 = vector.extract_strided_slice %21 {offsets = [0, 1, 0], sizes = [7, 16, 128], strides = [1, 1, 1]} : vector<7x18x128xf32> to vector<7x16x128xf32>
    %27 = vector.shape_cast %26 : vector<7x16x128xf32> to vector<112x128xf32>
    %28 = arith.truncf %27 : vector<112x128xf32> to vector<112x128xbf16>
    %c16_16 = arith.constant 16 : index
    %c128_17 = arith.constant 128 : index
    %29 = vector.load %arg13[%c16_16, %c128_17] : memref<128x1152xbf16, #tpu.memory_space<vmem>>, vector<112x128xbf16>
    tpu.vector_store %arg13[%c16_16, %c128_17], %28 {strides = array<i32>} : memref<128x1152xbf16, #tpu.memory_space<vmem>>, vector<112x128xbf16>,
    %30 = vector.extract_strided_slice %1 {offsets = [0, 0, 0], sizes = [7, 18, 128], strides = [1, 1, 1]} : vector<8x18x128xf32> to vector<7x18x128xf32>
    %31 = vector.extract_strided_slice %6 {offsets = [0, 2, 0], sizes = [1, 16, 128], strides = [1, 1, 1]} : vector<1x18x128xf32> to vector<1x16x128xf32>
    %32 = vector.shape_cast %31 : vector<1x16x128xf32> to vector<16x128xf32>
    %33 = arith.truncf %32 : vector<16x128xf32> to vector<16x128xbf16>
    %c0_18 = arith.constant 0 : index
    %c256 = arith.constant 256 : index
    %34 = vector.load %arg13[%c0_18, %c256] : memref<128x1152xbf16, #tpu.memory_space<vmem>>, vector<16x128xbf16>
    tpu.vector_store %arg13[%c0_18, %c256], %33 {strides = array<i32>} : memref<128x1152xbf16, #tpu.memory_space<vmem>>, vector<16x128xbf16>,
    %35 = vector.extract_strided_slice %30 {offsets = [0, 2, 0], sizes = [7, 16, 128], strides = [1, 1, 1]} : vector<7x18x128xf32> to vector<7x16x128xf32>
    %36 = vector.shape_cast %35 : vector<7x16x128xf32> to vector<112x128xf32>
    %37 = arith.truncf %36 : vector<112x128xf32> to vector<112x128xbf16>
    %c16_19 = arith.constant 16 : index
    %c256_20 = arith.constant 256 : index
    %38 = vector.load %arg13[%c16_19, %c256_20] : memref<128x1152xbf16, #tpu.memory_space<vmem>>, vector<112x128xbf16>
    tpu.vector_store %arg13[%c16_19, %c256_20], %37 {strides = array<i32>} : memref<128x1152xbf16, #tpu.memory_space<vmem>>, vector<112x128xbf16>,
    %39 = vector.extract_strided_slice %1 {offsets = [0, 0, 0], sizes = [8, 16, 128], strides = [1, 1, 1]} : vector<8x18x128xf32> to vector<8x16x128xf32>
    %40 = vector.shape_cast %39 : vector<8x16x128xf32> to vector<128x128xf32>
    %41 = arith.truncf %40 : vector<128x128xf32> to vector<128x128xbf16>
    %c0_21 = arith.constant 0 : index
    %c384 = arith.constant 384 : index
    %42 = vector.load %arg13[%c0_21, %c384] : memref<128x1152xbf16, #tpu.memory_space<vmem>>, vector<128x128xbf16>
    tpu.vector_store %arg13[%c0_21, %c384], %41 {strides = array<i32>} : memref<128x1152xbf16, #tpu.memory_space<vmem>>, vector<128x128xbf16>,
    %43 = vector.extract_strided_slice %1 {offsets = [0, 1, 0], sizes = [8, 16, 128], strides = [1, 1, 1]} : vector<8x18x128xf32> to vector<8x16x128xf32>
    %44 = vector.shape_cast %43 : vector<8x16x128xf32> to vector<128x128xf32>
    %45 = arith.truncf %44 : vector<128x128xf32> to vector<128x128xbf16>
    %c0_22 = arith.constant 0 : index
    %c512 = arith.constant 512 : index
    %46 = vector.load %arg13[%c0_22, %c512] : memref<128x1152xbf16, #tpu.memory_space<vmem>>, vector<128x128xbf16>
    tpu.vector_store %arg13[%c0_22, %c512], %45 {strides = array<i32>} : memref<128x1152xbf16, #tpu.memory_space<vmem>>, vector<128x128xbf16>,
    %47 = vector.extract_strided_slice %1 {offsets = [0, 2, 0], sizes = [8, 16, 128], strides = [1, 1, 1]} : vector<8x18x128xf32> to vector<8x16x128xf32>
    %48 = vector.shape_cast %47 : vector<8x16x128xf32> to vector<128x128xf32>
    %49 = arith.truncf %48 : vector<128x128xf32> to vector<128x128xbf16>
    %c0_23 = arith.constant 0 : index
    %c640 = arith.constant 640 : index
    %50 = vector.load %arg13[%c0_23, %c640] : memref<128x1152xbf16, #tpu.memory_space<vmem>>, vector<128x128xbf16>
    tpu.vector_store %arg13[%c0_23, %c640], %49 {strides = array<i32>} : memref<128x1152xbf16, #tpu.memory_space<vmem>>, vector<128x128xbf16>,
    %51 = vector.extract_strided_slice %1 {offsets = [1, 0, 0], sizes = [7, 18, 128], strides = [1, 1, 1]} : vector<8x18x128xf32> to vector<7x18x128xf32>
    %52 = vector.extract_strided_slice %51 {offsets = [0, 0, 0], sizes = [7, 16, 128], strides = [1, 1, 1]} : vector<7x18x128xf32> to vector<7x16x128xf32>
    %53 = vector.shape_cast %52 : vector<7x16x128xf32> to vector<112x128xf32>
    %54 = arith.truncf %53 : vector<112x128xf32> to vector<112x128xbf16>
    %c0_24 = arith.constant 0 : index
    %c768 = arith.constant 768 : index
    %55 = vector.load %arg13[%c0_24, %c768] : memref<128x1152xbf16, #tpu.memory_space<vmem>>, vector<112x128xbf16>
    tpu.vector_store %arg13[%c0_24, %c768], %54 {strides = array<i32>} : memref<128x1152xbf16, #tpu.memory_space<vmem>>, vector<112x128xbf16>,
    %56 = vector.extract_strided_slice %11 {offsets = [0, 0, 0], sizes = [1, 16, 128], strides = [1, 1, 1]} : vector<1x18x128xf32> to vector<1x16x128xf32>
    %57 = vector.shape_cast %56 : vector<1x16x128xf32> to vector<16x128xf32>
    %58 = arith.truncf %57 : vector<16x128xf32> to vector<16x128xbf16>
    %c112 = arith.constant 112 : index
    %c768_25 = arith.constant 768 : index
    %59 = vector.load %arg13[%c112, %c768_25] : memref<128x1152xbf16, #tpu.memory_space<vmem>>, vector<16x128xbf16>
    tpu.vector_store %arg13[%c112, %c768_25], %58 {strides = array<i32>} : memref<128x1152xbf16, #tpu.memory_space<vmem>>, vector<16x128xbf16>,
    %60 = vector.extract_strided_slice %1 {offsets = [1, 0, 0], sizes = [7, 18, 128], strides = [1, 1, 1]} : vector<8x18x128xf32> to vector<7x18x128xf32>
    %61 = vector.extract_strided_slice %60 {offsets = [0, 1, 0], sizes = [7, 16, 128], strides = [1, 1, 1]} : vector<7x18x128xf32> to vector<7x16x128xf32>
    %62 = vector.shape_cast %61 : vector<7x16x128xf32> to vector<112x128xf32>
    %63 = arith.truncf %62 : vector<112x128xf32> to vector<112x128xbf16>
    %c0_26 = arith.constant 0 : index
    %c896 = arith.constant 896 : index
    %64 = vector.load %arg13[%c0_26, %c896] : memref<128x1152xbf16, #tpu.memory_space<vmem>>, vector<112x128xbf16>
    tpu.vector_store %arg13[%c0_26, %c896], %63 {strides = array<i32>} : memref<128x1152xbf16, #tpu.memory_space<vmem>>, vector<112x128xbf16>,
    %65 = vector.extract_strided_slice %11 {offsets = [0, 1, 0], sizes = [1, 16, 128], strides = [1, 1, 1]} : vector<1x18x128xf32> to vector<1x16x128xf32>
    %66 = vector.shape_cast %65 : vector<1x16x128xf32> to vector<16x128xf32>
    %67 = arith.truncf %66 : vector<16x128xf32> to vector<16x128xbf16>
    %c112_27 = arith.constant 112 : index
    %c896_28 = arith.constant 896 : index
    %68 = vector.load %arg13[%c112_27, %c896_28] : memref<128x1152xbf16, #tpu.memory_space<vmem>>, vector<16x128xbf16>
    tpu.vector_store %arg13[%c112_27, %c896_28], %67 {strides = array<i32>} : memref<128x1152xbf16, #tpu.memory_space<vmem>>, vector<16x128xbf16>,
    %69 = vector.extract_strided_slice %1 {offsets = [1, 0, 0], sizes = [7, 18, 128], strides = [1, 1, 1]} : vector<8x18x128xf32> to vector<7x18x128xf32>
    %70 = vector.extract_strided_slice %69 {offsets = [0, 2, 0], sizes = [7, 16, 128], strides = [1, 1, 1]} : vector<7x18x128xf32> to vector<7x16x128xf32>
    %71 = vector.shape_cast %70 : vector<7x16x128xf32> to vector<112x128xf32>
    %72 = arith.truncf %71 : vector<112x128xf32> to vector<112x128xbf16>
    %c0_29 = arith.constant 0 : index
    %c1024 = arith.constant 1024 : index
    %73 = vector.load %arg13[%c0_29, %c1024] : memref<128x1152xbf16, #tpu.memory_space<vmem>>, vector<112x128xbf16>
    tpu.vector_store %arg13[%c0_29, %c1024], %72 {strides = array<i32>} : memref<128x1152xbf16, #tpu.memory_space<vmem>>, vector<112x128xbf16>,
    %74 = vector.extract_strided_slice %11 {offsets = [0, 2, 0], sizes = [1, 16, 128], strides = [1, 1, 1]} : vector<1x18x128xf32> to vector<1x16x128xf32>
    %75 = vector.shape_cast %74 : vector<1x16x128xf32> to vector<16x128xf32>
    %76 = arith.truncf %75 : vector<16x128xf32> to vector<16x128xbf16>
    %c112_30 = arith.constant 112 : index
    %c1024_31 = arith.constant 1024 : index
    %77 = vector.load %arg13[%c112_30, %c1024_31] : memref<128x1152xbf16, #tpu.memory_space<vmem>>, vector<16x128xbf16>
    tpu.vector_store %arg13[%c112_30, %c1024_31], %76 {strides = array<i32>} : memref<128x1152xbf16, #tpu.memory_space<vmem>>, vector<16x128xbf16>,
    %c0_32 = arith.constant 0 : index
    %c0_33 = arith.constant 0 : index
    %78 = vector.load %arg13[%c0_32, %c0_33] : memref<128x1152xbf16, #tpu.memory_space<vmem>>, vector<128x1152xbf16>
    %c0_34 = arith.constant 0 : index
    %c0_35 = arith.constant 0 : index
    %79 = vector.load %arg5[%c0_34, %c0_35] : memref<1152x128xbf16, #tpu.memory_space<vmem>>, vector<1152x128xbf16>
    %cst_36 = arith.constant dense<0.000000e+00> : vector<128x128xf32>
    %80 = tpu.matmul %78, %79, %cst_36 {dimension_numbers = #tpu.dot_dimension_numbers<[1], [0], [0], [1], [0, 0, 1, 1], [], []>} : vector<128x1152xbf16>, vector<1152x128xbf16>, vector<128x128xf32> -> vector<128x128xf32>
    %c0_37 = arith.constant 0 : index
    %c0_38 = arith.constant 0 : index
    %81 = vector.load %arg6[%c0_37, %c0_38] : memref<1x128xf32, #tpu.memory_space<vmem>>, vector<1x128xf32>
    %82 = vector.broadcast %81 : vector<1x128xf32> to vector<128x128xf32>
    %83 = arith.addf %80, %82 : vector<128x128xf32>
    %84 = arith.truncf %83 : vector<128x128xf32> to vector<128x128xbf16>
    %c0_39 = arith.constant 0 : index
    %c0_40 = arith.constant 0 : index
    %85 = vector.load %arg7[%c0_39, %c0_40] : memref<128x128xbf16, #tpu.memory_space<vmem>>, vector<128x128xbf16>
    %cst_41 = arith.constant dense<0.000000e+00> : vector<128x128xf32>
    %86 = tpu.matmul %84, %85, %cst_41 {dimension_numbers = #tpu.dot_dimension_numbers<[1], [0], [0], [1], [0, 0, 1, 1], [], []>} : vector<128x128xbf16>, vector<128x128xbf16>, vector<128x128xf32> -> vector<128x128xf32>
    %c0_42 = arith.constant 0 : index
    %c0_43 = arith.constant 0 : index
    %87 = vector.load %arg8[%c0_42, %c0_43] : memref<1x128xf32, #tpu.memory_space<vmem>>, vector<1x128xf32>
    %88 = vector.broadcast %87 : vector<1x128xf32> to vector<128x128xf32>
    %89 = arith.addf %86, %88 : vector<128x128xf32>
    %cst_44 = arith.constant 5.000000e-01 : f32
    %90 = vector.broadcast %cst_44 : f32 to vector<128x128xf32>
    %91 = arith.mulf %90, %89 : vector<128x128xf32>
    %cst_45 = arith.constant 4.471500e-02 : f32
    %92 = vector.broadcast %cst_45 : f32 to vector<128x128xf32>
    %93 = arith.mulf %92, %89 : vector<128x128xf32>
    %94 = arith.mulf %93, %89 : vector<128x128xf32>
    %95 = arith.mulf %94, %89 : vector<128x128xf32>
    %96 = arith.addf %89, %95 : vector<128x128xf32>
    %cst_46 = arith.constant 0.797884583 : f32
    %97 = vector.broadcast %cst_46 : f32 to vector<128x128xf32>
    %98 = arith.mulf %97, %96 : vector<128x128xf32>
    %99 = math.tanh %98 : vector<128x128xf32>
    %cst_47 = arith.constant 1.000000e+00 : f32
    %100 = vector.broadcast %cst_47 : f32 to vector<128x128xf32>
    %101 = arith.addf %100, %99 : vector<128x128xf32>
    %102 = arith.mulf %91, %101 : vector<128x128xf32>
    %103 = arith.truncf %102 : vector<128x128xf32> to vector<128x128xbf16>
    %c0_48 = arith.constant 0 : index
    %c0_49 = arith.constant 0 : index
    %104 = vector.load %arg9[%c0_48, %c0_49] : memref<128x128xbf16, #tpu.memory_space<vmem>>, vector<128x128xbf16>
    %cst_50 = arith.constant dense<0.000000e+00> : vector<128x128xf32>
    %105 = tpu.matmul %103, %104, %cst_50 {dimension_numbers = #tpu.dot_dimension_numbers<[1], [0], [0], [1], [0, 0, 1, 1], [], []>} : vector<128x128xbf16>, vector<128x128xbf16>, vector<128x128xf32> -> vector<128x128xf32>
    %c0_51 = arith.constant 0 : index
    %c0_52 = arith.constant 0 : index
    %106 = vector.load %arg10[%c0_51, %c0_52] : memref<1x128xf32, #tpu.memory_space<vmem>>, vector<1x128xf32>
    %107 = vector.broadcast %106 : vector<1x128xf32> to vector<128x128xf32>
    %108 = arith.addf %105, %107 : vector<128x128xf32>
    %c0_53 = arith.constant 0 : index
    %c0_54 = arith.constant 0 : index
    %109 = vector.load %arg11[%c0_53, %c0_54] : memref<1x128xf32, #tpu.memory_space<vmem>>, vector<1x128xf32>
    %110 = vector.broadcast %109 : vector<1x128xf32> to vector<128x128xf32>
    %111 = arith.mulf %110, %108 : vector<128x128xf32>
    %112 = vector.extract_strided_slice %1 {offsets = [0, 1, 0], sizes = [8, 16, 128], strides = [1, 1, 1]} : vector<8x18x128xf32> to vector<8x16x128xf32>
    %113 = vector.shape_cast %111 : vector<128x128xf32> to vector<8x16x128xf32>
    %114 = arith.addf %112, %113 : vector<8x16x128xf32>
    %c0_55 = arith.constant 0 : index
    %c0_56 = arith.constant 0 : index
    %c0_57 = arith.constant 0 : index
    %c0_58 = arith.constant 0 : index
    %115 = vector.load %arg12[%c0_55, %c0_56, %c0_57, %c0_58] : memref<1x8x16x128xf32, #tpu.memory_space<vmem>>, vector<1x8x16x128xf32>
    %116 = vector.shape_cast %115 : vector<1x8x16x128xf32> to vector<8x16x128xf32>
    %117 = vector.shape_cast %114 : vector<8x16x128xf32> to vector<1x8x16x128xf32>
    tpu.vector_store %arg12[%c0_55, %c0_56, %c0_57, %c0_58], %117 {strides = array<i32>} : memref<1x8x16x128xf32, #tpu.memory_space<vmem>>, vector<1x8x16x128xf32>,
    return
  }
  func.func @transform_0(%arg0: i32, %arg1: i32) -> (i32, i32, i32, i32) {
    %c0_i32 = arith.constant 0 : i32
    %c0_i32_0 = arith.constant 0 : i32
    %c0_i32_1 = arith.constant 0 : i32
    return %arg0, %arg1, %c0_i32, %c0_i32_0 : i32, i32, i32, i32
  }
  func.func @transform_1(%arg0: i32, %arg1: i32) -> (i32, i32, i32, i32) {
    %c8_i32 = arith.constant 8 : i32
    %0 = arith.muli %arg1, %c8_i32 : i32
    %c1_i32 = arith.constant 1 : i32
    %1 = arith.subi %0, %c1_i32 : i32
    %c0_i32 = arith.constant 0 : i32
    %2 = arith.maxsi %1, %c0_i32 : i32
    %c0_i32_0 = arith.constant 0 : i32
    %c0_i32_1 = arith.constant 0 : i32
    %c0_i32_2 = arith.constant 0 : i32
    return %arg0, %2, %c0_i32_0, %c0_i32_1 : i32, i32, i32, i32
  }
  func.func @transform_2(%arg0: i32, %arg1: i32) -> (i32, i32, i32, i32) {
    %c1_i32 = arith.constant 1 : i32
    %0 = arith.addi %arg1, %c1_i32 : i32
    %c8_i32 = arith.constant 8 : i32
    %1 = arith.muli %0, %c8_i32 : i32
    %c15_i32 = arith.constant 15 : i32
    %2 = arith.minsi %1, %c15_i32 : i32
    %c0_i32 = arith.constant 0 : i32
    %c0_i32_0 = arith.constant 0 : i32
    %c0_i32_1 = arith.constant 0 : i32
    return %arg0, %2, %c0_i32, %c0_i32_0 : i32, i32, i32, i32
  }
  func.func @transform_3(%arg0: i32, %arg1: i32) -> (i32, i32) {
    %c0_i32 = arith.constant 0 : i32
    %c0_i32_0 = arith.constant 0 : i32
    %c0_i32_1 = arith.constant 0 : i32
    return %c0_i32, %c0_i32_0 : i32, i32
  }
  func.func @transform_4(%arg0: i32, %arg1: i32) -> (i32, i32) {
    %c0_i32 = arith.constant 0 : i32
    %c0_i32_0 = arith.constant 0 : i32
    %c0_i32_1 = arith.constant 0 : i32
    return %c0_i32, %c0_i32_0 : i32, i32
  }
  func.func @transform_5(%arg0: i32, %arg1: i32) -> (i32, i32) {
    %c0_i32 = arith.constant 0 : i32
    %c0_i32_0 = arith.constant 0 : i32
    %c0_i32_1 = arith.constant 0 : i32
    return %c0_i32, %c0_i32_0 : i32, i32
  }
  func.func @transform_6(%arg0: i32, %arg1: i32) -> (i32, i32) {
    %c0_i32 = arith.constant 0 : i32
    %c0_i32_0 = arith.constant 0 : i32
    %c0_i32_1 = arith.constant 0 : i32
    return %c0_i32, %c0_i32_0 : i32, i32
  }
  func.func @transform_7(%arg0: i32, %arg1: i32) -> (i32, i32) {
    %c0_i32 = arith.constant 0 : i32
    %c0_i32_0 = arith.constant 0 : i32
    %c0_i32_1 = arith.constant 0 : i32
    return %c0_i32, %c0_i32_0 : i32, i32
  }
  func.func @transform_8(%arg0: i32, %arg1: i32) -> (i32, i32) {
    %c0_i32 = arith.constant 0 : i32
    %c0_i32_0 = arith.constant 0 : i32
    %c0_i32_1 = arith.constant 0 : i32
    return %c0_i32, %c0_i32_0 : i32, i32
  }
  func.func @transform_9(%arg0: i32, %arg1: i32) -> (i32, i32) {
    %c0_i32 = arith.constant 0 : i32
    %c0_i32_0 = arith.constant 0 : i32
    %c0_i32_1 = arith.constant 0 : i32
    return %c0_i32, %c0_i32_0 : i32, i32
  }
  func.func @transform_10(%arg0: i32, %arg1: i32) -> (i32, i32, i32, i32) {
    %c0_i32 = arith.constant 0 : i32
    %c0_i32_0 = arith.constant 0 : i32
    %c0_i32_1 = arith.constant 0 : i32
    return %arg0, %arg1, %c0_i32, %c0_i32_0 : i32, i32, i32, i32
  }
}

</mosaic_0001>

<bundles_post_ra>
// kernel: convnext_block_pallas.1
= control target key start
LH: loop header
LB: loop body
LE: loop exit
PB: predicated region body
PF: predicated region fallthrough
CT: control target
= control target key end

     0   :  { %s4565_s13 = smov 0   ;;  %s4567_s14 = smov 0   ;;  %s5520_s0 = inlined_call_operand.vmem [shape: f32[2,16,18,128], index: 0, kind: input, shape index: {}, may-alias: {0,1,2}]   ;;  %s5521_s1 = inlined_call_operand.vmem [shape: f32[2,16,18,128], index: 1, kind: input, shape index: {}, may-alias: {0,1,2}]   ;;  %s5522_s2 = inlined_call_operand.vmem [shape: f32[2,16,18,128], index: 2, kind: input, shape index: {}, may-alias: {0,1,2}]   ;;  %s5523_s3 = inlined_call_operand.vmem [shape: bf16[1152,128], index: 3, kind: input, shape index: {}]   ;;  %s5524_s4 = inlined_call_operand.vmem [shape: f32[1,128], index: 4, kind: input, shape index: {}]   ;;  %s5525_s5 = inlined_call_operand.vmem [shape: bf16[128,128], index: 5, kind: input, shape index: {}]   ;;  %s5526_s6 = inlined_call_operand.vmem [shape: f32[1,128], index: 6, kind: input, shape index: {}]   ;;  %s5527_s7 = inlined_call_operand.vmem [shape: bf16[128,128], index: 7, kind: input, shape index: {}]   ;;  %s5528_s8 = inlined_call_operand.vmem [shape: f32[1,128], index: 8, kind: input, shape index: {}]   ;;  %s5529_s9 = inlined_call_operand.vmem [shape: f32[1,128], index: 9, kind: input, shape index: {}]   ;;  %s5530_s10 = inlined_call_operand.vmem [shape: f32[2,16,16,128], index: 10, kind: output, shape index: {}]  }
   0x1   :  { %s4569_s15 = smov 0   ;;  %s4571_s16 = smov 0  }
   0x2   :  { %s4573_s17 = smov 0  }
   0x3 LB: > { %s29_s18 = sadd.s32 1, %s4500_s15  ;;  %s32_s19 = sadd.s32 1, %s4504_s16  ;;  %s4508_s17 = sphi %s4573_s17, %s20_s17   ;;  %s4504_s16 = sphi %s4571_s16, %s5585_s16   ;;  %s4500_s15 = sphi %s4569_s15, %s5584_s15   ;;  %s4496_s14 = sphi %s4567_s14, %s5583_s14   ;;  %s4492_s13 = sphi %s4565_s13, %s5582_s13  }
   0x4   : > { %p30_p0 = scmp.ge.s32.totalorder %s29_s18, 2  ;;  %p3446_p1 = scmp.ge.s32.totalorder %s4508_s17, 1 }
   0x5   : > { %p398_p2 = scmp.lt.s32.totalorder %s4508_s17, 5 }
   0x6   : > { %s5587_s18 = smov (%p30_p0, %s29_s18), 0  ;;  %s5589_s19 = smov (!%p30_p0, %s32_s19), %s4504_s16 }
   0x7   : > { %5531 = sst [smem:[#allocation3_spill]] %s5587_s18  ;;  %p399_p3 = pnand %p3446_p1, %p398_p2 }
   0x8   : > { %p34_p4 = scmp.ge.s32.totalorder %s5589_s19, 2 }
   0x9   : > { %402 = sbr.rel (%p399_p3) target bundleno = 861 (0x35d), region = 60 }
   0xa   : > { %s5591_s19 = smov (%p34_p4, %s5589_s19), 0 }
   0xb   : > { %5532 = sst [smem:[#allocation4_spill]] %s5591_s19 }
   0xe   : > { %v4210_v0 = vld [vmem:[%s5523_s3 + $0x78] sm:$0xff]   ;;  %p473_p5 = scmp.lt.s32.totalorder %s4496_s14, 1  ;;  %v4213_v3 = vld [vmem:[%s5523_s3 + $0x70] sm:$0xff]   ;;  %s4616_s30 = sshll.u32 %s4492_s13, 3  ;;  %v4217_v7 = vld [vmem:[%s5523_s3 + $0x68] sm:$0xff]   ;;  %vm829_vm0 = vcmask 1042432  }
   0xf   : > { %v4211_v1 = vld [vmem:[%s5523_s3 + $0x38] sm:$0xff]   ;;  %3750 = vmatprep.subr.bf16.mxu0 %v4210_v0  ;;  %v4215_v5 = vld [vmem:[%s5523_s3 + $0x30] sm:$0xff]   ;;  %p475_p6 = scmp.lt.s32.totalorder %s4616_s30, 15  ;;  %s3450_s24 = sadd.s32 4294967295, %s4616_s30  ;;  %v4219_v9 = vld [vmem:[%s5523_s3 + $0x28] sm:$0xff]   ;;  %vm830_vm1 = vcmask 1046532  }
  0x10   : > { %v4212_v2 = vld [vmem:[%s5523_s3 + $0xf8] sm:$0xff]   ;;  %3751 = vmatpush3.bf16.msra.mxu0 %v4211_v1  ;;  %v4216_v6 = vld [vmem:[%s5523_s3 + $0xf0] sm:$0xff]   ;;  %s5593_s14 = smov (!%p473_p5, %s4496_s14), 1  ;;  %p485_p7 = scmp.gt.s32.totalorder %s3450_s24, 0  ;;  %v4220_v10 = vld [vmem:[%s5523_s3 + $0xe8] sm:$0xff]   ;;  %vm709_vm2 = vcmask 1046528  }
  0x11   : > { %3814 = vmatprep.subr.bf16.mxu1 %v4212_v2  ;;  %v4214_v4 = vld [vmem:[%s5523_s3 + $0xb8] sm:$0xff]   ;;  %3752 = vmatprep.subr.bf16.mxu0 %v4213_v3  ;;  %v4218_v8 = vld [vmem:[%s5523_s3 + $0xb0] sm:$0xff]   ;;  %s4639_s29 = scalar_select %p475_p6, %s4616_s30, 15  ;;  %v4221_v11 = vld [vmem:[%s5523_s3 + $0x60] sm:$0xff]   ;;  %vm657_vm4 = vsmask.f32 3328 }
  0x12   : > { %3815 = vmatpush3.bf16.msra.mxu1 %v4214_v4  ;;  %p3451_p8 = scmp.lt.s32.totalorder %s3450_s24, 15  ;;  %s5595_s24 = smov (!%p485_p7, %s3450_s24), 0  ;;  %v4222_v12 = vld [vmem:[%s5523_s3 + $0xa8] sm:$0xff]   ;;  %v4223_v13 = vld [vmem:[%s5523_s3 + $0x20] sm:$0xff]   ;;  %v4225_v15 = vld [vmem:[%s5523_s3 + $0x58] sm:$0xff]   ;;  %vm843_vm6 = vcmask 1045504  }
  0x13   : > { %3816 = vmatprep.subr.bf16.mxu1 %v4216_v6  ;;  %s3463_s25 = sshll.u32 %s4639_s29, 1  ;;  %v4224_v14 = vld [vmem:[%s5523_s3 + $0xe0] sm:$0xff]   ;;  %s3464_s12 = sshll.u32 %s5593_s14, 5  ;;  %v4227_v17 = vld [vmem:[%s5523_s3 + $0x18] sm:$0xff]   ;;  %v4229_v19 = vld [vmem:[%s5523_s3 + $0x50] sm:$0xff]   ;;  %vm3198_vm10 = vcmask 1040384  }
  0x14   : > { %3753 = vmatpush3.bf16.msra.mxu0 %v4215_v5  ;;  %s5597_s24 = smov (!%p3451_p8, %s5595_s24), 15  ;;  %s4661_s22 = sadd.s32 %s3464_s12, %s3463_s25  ;;  %v4226_v16 = vld [vmem:[%s5523_s3 + $0xa0] sm:$0xff]   ;;  %v4228_v18 = vld [vmem:[%s5523_s3 + $0xd8] sm:$0xff]   ;;  %v4231_v21 = vld [vmem:[%s5523_s3 + $0x10] sm:$0xff]   ;;  %vm658_vm5 = vsmask.f32 7440 }
  0x15   : > { %3754 = vmatprep.subr.bf16.mxu0 %v4217_v7  ;;  %s4670_s28 = smul.u32 48, %s5593_s14  ;;  %v4230_v20 = vld [vmem:[%s5523_s3 + $0x98] sm:$0xff]   ;;  %v4232_v22 = vld [vmem:[%s5523_s3 + $0xd0] sm:$0xff]   ;;  %v4233_v23 = vld [vmem:[%s5523_s3 + $0x48] sm:$0xff]   ;;  %s3695_s19 = sadd.s32 8, %s4616_s30 }
  0x16   : > { %3817 = vmatpush3.bf16.msra.mxu1 %v4218_v8  ;;  %s4168_s25 = smul.u32 3, %s5597_s24  ;;  %v4234_v24 = vld [vmem:[%s5523_s3 + $0x90] sm:$0xff]   ;;  %p4696_p9 = scmp.lt.s32.totalorder %s3695_s19, 15  ;;  %v4235_v25 = vld [vmem:[%s5523_s3 + $0x8] sm:$0xff]   ;;  %v4237_v27 = vld [vmem:[%s5523_s3 + $0x40] sm:$0xff]  }
  0x17   : > { %3818 = vmatprep.subr.bf16.mxu1 %v4220_v10  ;;  %s4166_s27 = smul.u32 3, %s4639_s29  ;;  %v4236_v26 = vld [vmem:[%s5523_s3 + $0xc8] sm:$0xff]   ;;  %p553_p10 = scmp.gt.s32.totalorder %s4492_s13, 0  ;;  %v4239_v29 = vld [vmem:[%s5523_s3] sm:$0xff]   ;;  %v4251_v34 = vld [vmem:[%s5523_s3 + $0x178] sm:$0xff]  }
  0x18   : > { %3755 = vmatpush3.bf16.msra.mxu0 %v4219_v9  ;;  %s493_s20 = sadd.s32 %s4168_s25, %s4670_s28  ;;  %s5599_s19 = smov (!%p4696_p9, %s3695_s19), 15  ;;  %v4238_v28 = vld [vmem:[%s5523_s3 + $0x88] sm:$0xff]   ;;  %v4240_v30 = vld [vmem:[%s5523_s3 + $0xc0] sm:$0xff]   ;;  %vm4768_vm7 = vmor %vm829_vm0, %vm830_vm1 }
  0x19   : > { %3756 = vmatprep.subr.bf16.mxu0 %v4221_v11  ;;  %s479_s26 = sadd.s32 %s4670_s28, %s4166_s27  ;;  %s3456_s11 = sshll.u32 %s493_s20, 3  ;;  %v4250_v33 = vld [vmem:[%s5523_s3 + $0x80] sm:$0xff]   ;;  %vm4794_vm8 = vmor %vm657_vm4, %vm658_vm5 }
  0x1a   : > { %3819 = vmatpush3.bf16.msra.mxu1 %v4222_v12  ;;  %s5601_s19 = smov (!%p4696_p9, %s5599_s19), 15  ;;  %s3448_s25 = sshll.u32 %s479_s26, 3 }
  0x1b   : > { %3820 = vmatprep.subr.bf16.mxu1 %v4224_v14  ;;  %s4727_s12 = scalar_lea.vmem %s5521_s1, %s3456_s11  ;;  %s4729_s29 = smul.u32 3, %s5601_s19 }
  0x1c   : > { %3757 = vmatpush3.bf16.msra.mxu0 %v4223_v13  ;;  %s557_s21 = scalar_select %p553_p10, 1, 0  ;;  %v556_v31 = vld [vmem:[%s4727_s12 + $0x10] sm:$0x3] }
  0x1d   : > { %3758 = vmatprep.subr.bf16.mxu0 %v4225_v15  ;;  %s4736_s27 = scalar_lea.vmem %s5520_s0, %s3448_s25  ;;  %s510_s11 = sadd.s32 %s4729_s29, %s4670_s28 }
  0x1e   : > { %3821 = vmatpush3.bf16.msra.mxu1 %v4226_v16  ;;  %v558_v32 = vstv %s557_s21  ;;  %s4242_s25 = scalar_select %p553_p10, 255, 0  ;;  %v529_v37 = vld [vmem:[%s4736_s27] sm:$0xff]  ;;  %v4751_v38 = vld [vmem:[%s4736_s27 + $0x8] sm:$0xff]  ;;  %v4754_v39 = vld [vmem:[%s4736_s27 + $0x10] sm:$0x3] }
  0x1f   : > { %3822 = vmatprep.subr.bf16.mxu1 %v4228_v18  ;;  %vm559_vm3 = vcmp.eq.s32.totalorder %v558_v32, 1  ;;  %v3698_v41 = vpack.c.bf16 %v529_v37, %v529_v37  ;;  %v3699_v42 = vpack.c.bf16 %v4751_v38, %v4751_v38  ;;  %v710_v43 = vrot.slane %v529_v37, 1  ;;  %v4773_v59 = vld [vmem:[%s4736_s27 + $0x18] sm:$0xff]  ;;  %v4777_v0 = vld [vmem:[%s4736_s27 + $0x20] sm:$0xff]  ;;  %v4780_v1 = vld [vmem:[%s4736_s27 + $0x28] sm:$0x3] }
  0x20   : > { %3759 = vmatpush3.bf16.msra.mxu0 %v4227_v17  ;;  %v562_v35 = vsel %vm559_vm3, %v556_v31, 0.0  ;;  %v4243_v40 = vld [vmem:[%s4727_s12] sm:%s4242_s25]  ;;  %v711_v44 = vrot.slane %v4751_v38, 1  ;;  %v4246_v45 = vld [vmem:[%s4727_s12 + $0x8] sm:%s4242_s25]  ;;  %v844_v49 = vrot.slane %v529_v37, 2  ;;  %v845_v51 = vrot.slane %v4751_v38, 2 }
  0x21   : > { %3760 = vmatprep.subr.bf16.mxu0 %v4229_v19  ;;  %v3712_v36 = vpack.c.bf16 %v562_v35, %v562_v35  ;;  %v3696_v46 = vpack.c.bf16 %v4243_v40, %v4243_v40  ;;  %v3697_v50 = vpack.c.bf16 %v4246_v45, %v4246_v45  ;;  %971 = vst [vmem:[#allocation2 + $0xc] sm:$0xf] %v3698_v41  ;;  %972 = vst [vmem:[#allocation2 + $0x30] sm:$0xf] %v3699_v42  ;;  %v4790_v14 = vld [vmem:[%s4736_s27 + $0x30] sm:$0xff]  ;;  %v4280_v40 = vld [vmem:[%s5523_s3 + $0x1f8] sm:$0xff]  }
  0x22   : > { %3823 = vmatpush3.bf16.msra.mxu1 %v4230_v20  ;;  %639 = vst [vmem:[#allocation2 + $0x48] sm:$0xf] %v3698_v41  ;;  %640 = vst [vmem:[#allocation2 + $0x6c] sm:$0xf] %v3699_v42  ;;  %v712_v52 = vsel %vm709_vm2, %v710_v43, %v711_v44  ;;  %v713_v53 = vrot.slane %v4754_v39, 1  ;;  %v3700_v11 = vpack.c.bf16 %v4773_v59, %v4773_v59  ;;  %v847_v18 = vrot.slane %v4754_v39, 2 }
  0x23   : > { %3824 = vmatprep.subr.bf16.mxu1 %v4232_v22  ;;  %v680_v47 = vshll.u32 %v3712_v36, 16  ;;  %v837_v48 = vrot.slane %v3712_v36, 5  ;;  %581 = vst [vmem:[#allocation2] sm:$0xf] %v3696_v46  ;;  %v661_v54 = vshrl.u32 %v3696_v46, 16  ;;  %v664_v55 = vshll.u32 %v3696_v46, 16 }
  0x24   : > { %3761 = vmatpush3.bf16.msra.mxu0 %v4231_v21  ;;  %v3497_v58 = vrot.slane %v3696_v46, 9  ;;  %582 = vst [vmem:[#allocation2 + $0x24] sm:$0xf] %v3697_v50  ;;  %v670_v60 = vshll.u32 %v3697_v50, 16  ;;  %v674_v61 = vshrl.u32 %v3697_v50, 16  ;;  %v834_v62 = vrot.slane %v3697_v50, 5 }
  0x25   : > { %3762 = vmatprep.subr.bf16.mxu0 %v4233_v23  ;;  %v4764_v56 = vrot.slane %v680_v47, 5  ;;  %v714_v63 = vsel %vm709_vm2, %v711_v44, %v713_v53  ;;  %v663_v2 = vrot.slane %v661_v54, 4  ;;  %v666_v3 = vrot.slane %v664_v55, 5  ;;  %v4802_v20 = vld [vmem:[%s4736_s27 + $0x38] sm:$0xff]  ;;  %973 = vst [vmem:[#allocation2 + $0x54] sm:$0xf] %v3700_v11 }
  0x26   : > { %3825 = vmatpush3.bf16.msra.mxu1 %v4234_v24  ;;  %v3713_v4 = vpack.c.bf16 %v712_v52, %v712_v52  ;;  %v3714_v5 = vpack.c.bf16 %v714_v63, %v714_v63  ;;  %v672_v6 = vrot.slane %v670_v60, 5  ;;  %v676_v7 = vrot.slane %v674_v61, 4  ;;  %641 = vst [vmem:[#allocation2 + $0x90] sm:$0xf] %v3700_v11  ;;  %1052 = vst [vmem:[#allocation2 + $0x18] sm:$0xf] %v3700_v11 }
  0x27   : > { %3826 = vmatprep.subr.bf16.mxu1 %v4236_v26  ;;  %v835_v8 = vsel %vm4768_vm7, %v3497_v58, %v834_v62  ;;  %v836_v9 = vrot.slane %v834_v62, 4  ;;  %v667_v10 = vor.u32 %v666_v3, %v663_v2  ;;  %v3701_v12 = vpack.c.bf16 %v4777_v0, %v4777_v0  ;;  %v4823_v35 = vld [vmem:[%s4736_s27 + $0x50] sm:$0xff]  ;;  %v4281_v53 = vld [vmem:[%s5523_s3 + $0x1b8] sm:$0xff]   ;;  %p563_p11 = scmp.lt.s32.totalorder %s4492_s13, 1  ;;  %s3461_s25 = sshll.u32 %s510_s11, 3 }
  0x28   : > { %3763 = vmatpush3.bf16.msra.mxu0 %v4235_v25  ;;  %841 = vst [vmem:[#allocation2 + $0x8] sm:$0xf] %v835_v8  ;;  %815 = vst [vmem:[#allocation2 + $0x4c] sm:$0xf] %v3713_v4  ;;  %v846_v13 = vsel %vm843_vm6, %v844_v49, %v845_v51  ;;  %v677_v16 = vor.u32 %v676_v7, %v672_v6  ;;  %v715_v22 = vrot.slane %v4773_v59, 1  ;;  %v716_v23 = vrot.slane %v4777_v0, 1  ;;  %s512_s23 = scalar_lea.vmem %s5522_s2, %s3461_s25 }
  0x29   : > { %3764 = vmatprep.subr.bf16.mxu0 %v4237_v27  ;;  %816 = vst [vmem:[#allocation2 + $0x70] sm:$0xf] %v3714_v5  ;;  %1005 = vst [vmem:[#allocation2 + $0x10] sm:$0xf] %v3713_v4  ;;  %v838_v17 = vsel %vm4768_vm7, %v836_v9, %v837_v48  ;;  %v3727_v19 = vpack.c.bf16 %v846_v13, %v846_v13  ;;  %v668_v21 = vrot.slane %v667_v10, 4  ;;  %v718_v24 = vrot.slane %v4780_v1, 1 }
  0x2a   : > { %3827 = vmatpush3.bf16.msra.mxu1 %v4238_v28  ;;  %1006 = vst [vmem:[#allocation2 + $0x34] sm:$0xf] %v3714_v5  ;;  %842 = vst [vmem:[#allocation2 + $0x2c] sm:$0xf] %v838_v17  ;;  %v678_v25 = vrot.slane %v677_v16, 4  ;;  %v848_v26 = vsel %vm843_vm6, %v845_v51, %v847_v18  ;;  %v3702_v27 = vpack.c.bf16 %v4790_v14, %v4790_v14  ;;  %v849_v39 = vrot.slane %v4773_v59, 2 }
  0x2b   : > { %3828 = vmatprep.subr.bf16.mxu1 %v4240_v30  ;;  %974 = vst [vmem:[#allocation2 + $0x78] sm:$0xf] %v3701_v12  ;;  %642 = vst [vmem:[#allocation2 + $0xb4] sm:$0xf] %v3701_v12  ;;  %v3703_v28 = vpack.c.bf16 %v4802_v20, %v4802_v20  ;;  %v3728_v30 = vpack.c.bf16 %v848_v26, %v848_v26  ;;  %v717_v31 = vsel %vm709_vm2, %v715_v22, %v716_v23  ;;  %v4255_v55 = vld [vmem:[#allocation2 + $0xc] ss:$36 sps:$4 sm:$0xff]  }
  0x2c   : > { %3765 = vmatpush3.bf16.msra.mxu0 %v4239_v29  ;;  %1053 = vst [vmem:[#allocation2 + $0x3c] sm:$0xf] %v3701_v12  ;;  %949 = vst [vmem:[#allocation2 + $0x50] sm:$0xf] %v3727_v19  ;;  %v673_v29 = vsel %vm4794_vm8, %v668_v21, %v672_v6  ;;  %v719_v32 = vsel %vm709_vm2, %v716_v23, %v718_v24  ;;  %v683_v36 = vsel %vm4794_vm8, %v678_v25, %v4764_v56  ;;  %v4247_v9 = vld [vmem:[#allocation2] ss:$36 sps:$4 sm:$0xff]  }
  0x2d   : > { %3878 = vmatprep.subr.bf16.mxu0 %v4251_v34  ;;  %1036 = vst [vmem:[#allocation2 + $0x14] sm:$0xf] %v3727_v19  ;;  %v4820_v34 = vld [vmem:[%s4736_s27 + $0x48] sm:$0xff]  ;;  %686 = vst [vmem:[#allocation2 + $0x4] sm:$0xf] %v673_v29  ;;  %v3715_v37 = vpack.c.bf16 %v717_v31, %v717_v31  ;;  %v3716_v38 = vpack.c.bf16 %v719_v32, %v719_v32  ;;  %v850_v41 = vrot.slane %v4777_v0, 2  ;;  %2307 = vmatprep.mubr.bf16.mxu1 %v4255_v55 }
  0x2e   : > { %3829 = vmatpush3.bf16.msra.mxu1 %v4250_v33  ;;  %v4817_v33 = vld [vmem:[%s4736_s27 + $0x40] sm:$0x3]  ;;  %975 = vst [vmem:[#allocation2 + $0x9c] sm:$0xf] %v3702_v27  ;;  %976 = vst [vmem:[#allocation2 + $0xc0] sm:$0xf] %v3703_v28  ;;  %v3704_v46 = vpack.c.bf16 %v4820_v34, %v4820_v34  ;;  %v3705_v47 = vpack.c.bf16 %v4823_v35, %v4823_v35 }
  0x2f   : > { %643 = vst [vmem:[#allocation2 + $0xd8] sm:$0xf] %v3702_v27  ;;  %644 = vst [vmem:[#allocation2 + $0xfc] sm:$0xf] %v3703_v28  ;;  %v852_v42 = vrot.slane %v4780_v1, 2  ;;  %v720_v43 = vrot.slane %v4790_v14, 1  ;;  %3942 = vmatprep.subr.bf16.mxu1 %v4280_v40  ;;  %v851_v49 = vsel %vm843_vm6, %v849_v39, %v850_v41 }
  0x30   : > { %1054 = vst [vmem:[#allocation2 + $0x60] sm:$0xf] %v3702_v27  ;;  %1055 = vst [vmem:[#allocation2 + $0x84] sm:$0xf] %v3703_v28  ;;  %v721_v44 = vrot.slane %v4802_v20, 1  ;;  %v723_v45 = vrot.slane %v4817_v33, 1  ;;  %v3729_v56 = vpack.c.bf16 %v851_v49, %v851_v49 }
  0x31   : > { %687 = vst [vmem:[#allocation2 + $0x28] sm:$0xf] %v683_v36  ;;  %950 = vst [vmem:[#allocation2 + $0x74] sm:$0xf] %v3728_v30  ;;  %v854_v48 = vrot.slane %v4790_v14, 2  ;;  %v853_v50 = vsel %vm843_vm6, %v850_v41, %v852_v42  ;;  %v855_v52 = vrot.slane %v4802_v20, 2 }
  0x32   : > { %1037 = vst [vmem:[#allocation2 + $0x38] sm:$0xf] %v3728_v30  ;;  %817 = vst [vmem:[#allocation2 + $0x94] sm:$0xf] %v3715_v37  ;;  %v722_v51 = vsel %vm709_vm2, %v720_v43, %v721_v44  ;;  %v4253_v54 = vld [vmem:[#allocation2 + $0x8] ss:$36 sps:$4 sm:$0xff]   ;;  %v3730_v58 = vpack.c.bf16 %v853_v50, %v853_v50  ;;  %v724_v59 = vsel %vm709_vm2, %v721_v44, %v723_v45 }
  0x33   : > { %818 = vst [vmem:[#allocation2 + $0xb8] sm:$0xf] %v3716_v38  ;;  %1007 = vst [vmem:[#allocation2 + $0x58] sm:$0xf] %v3715_v37  ;;  %v3717_v60 = vpack.c.bf16 %v722_v51, %v722_v51  ;;  %v3718_v61 = vpack.c.bf16 %v724_v59, %v724_v59  ;;  %v856_v62 = vsel %vm843_vm6, %v854_v48, %v855_v52  ;;  %v857_v63 = vrot.slane %v4817_v33, 2  ;;  %v4252_v1 = vld [vmem:[%s5523_s3 + $0x138] sm:$0xff]  }
  0x34   : > { %1008 = vst [vmem:[#allocation2 + $0x7c] sm:$0xf] %v3716_v38  ;;  %1076 = vst [vmem:[#allocation2 + $0x1c] sm:$0xf] %v3715_v37  ;;  %v540_v0 = vld [vmem:[%s4736_s27 + $0x58] sm:$0x3]  ;;  %v3731_v3 = vpack.c.bf16 %v856_v62, %v856_v62  ;;  %2308 = vmatmul.mubr.bf16.vlgmr.msra.gmra.mxu1 %v4253_v54 }
  0x35   : > { %1077 = vst [vmem:[#allocation2 + $0x40] sm:$0xf] %v3716_v38  ;;  %977 = vst [vmem:[#allocation2 + $0xe4] sm:$0xf] %v3704_v46  ;;  %v4256_v2 = vld [vmem:[#allocation2 + $0x4c] ss:$36 sps:$4 sm:$0xff]   ;;  %v858_v7 = vsel %vm843_vm6, %v855_v52, %v857_v63  ;;  %3943 = vmatpush3.bf16.msra.mxu1 %v4281_v53 }
  0x36   : > { %978 = vst [vmem:[#allocation2 + $0x108] sm:$0xf] %v3705_v47  ;;  %645 = vst [vmem:[#allocation2 + $0x120] sm:$0xf] %v3704_v46  ;;  %v725_v4 = vrot.slane %v4820_v34, 1  ;;  %v726_v5 = vrot.slane %v4823_v35, 1  ;;  %v3732_v11 = vpack.c.bf16 %v858_v7, %v858_v7 }
  0x37   : > { %646 = vst [vmem:[#allocation2 + $0x144] sm:$0xf] %v3705_v47  ;;  %1056 = vst [vmem:[#allocation2 + $0xa8] sm:$0xf] %v3704_v46  ;;  %v728_v6 = vrot.slane %v540_v0, 1  ;;  %v859_v8 = vrot.slane %v4820_v34, 2 }
  0x38   : > { %1057 = vst [vmem:[#allocation2 + $0xcc] sm:$0xf] %v3705_v47  ;;  %951 = vst [vmem:[#allocation2 + $0x98] sm:$0xf] %v3729_v56  ;;  %v4249_v10 = vld [vmem:[#allocation2 + $0x4] ss:$36 sps:$4 sm:$0xff]   ;;  %v727_v12 = vsel %vm709_vm2, %v725_v4, %v726_v5 }
  0x39   : > { %952 = vst [vmem:[#allocation2 + $0xbc] sm:$0xf] %v3730_v58  ;;  %1038 = vst [vmem:[#allocation2 + $0x5c] sm:$0xf] %v3729_v56  ;;  %v729_v13 = vsel %vm709_vm2, %v726_v5, %v728_v6  ;;  %v860_v14 = vrot.slane %v4823_v35, 2  ;;  %v4258_v16 = vld [vmem:[%s5523_s3 + $0x170] sm:$0xff]   ;;  %v3719_v18 = vpack.c.bf16 %v727_v12, %v727_v12  ;;  %2210 = vmatprep.mubr.bf16.mxu0 %v4249_v10 }
  0x3a   : > { %1039 = vst [vmem:[#allocation2 + $0x80] sm:$0xf] %v3730_v58  ;;  %1122 = vst [vmem:[#allocation2 + $0x20] sm:$0xf] %v3729_v56  ;;  %v4261_v17 = vld [vmem:[#allocation2 + $0x54] ss:$36 sps:$4 sm:$0xff]   ;;  %v3720_v19 = vpack.c.bf16 %v729_v13, %v729_v13  ;;  %2211 = vmatmul.mubr.bf16.vlgmr.msra.gmra.mxu0 %v4247_v9 }
  0x3b   : > { %1123 = vst [vmem:[#allocation2 + $0x44] sm:$0xf] %v3730_v58  ;;  %819 = vst [vmem:[#allocation2 + $0xdc] sm:$0xf] %v3717_v60  ;;  %v862_v20 = vrot.slane %v540_v0, 2  ;;  %v4260_v21 = vld [vmem:[%s5523_s3 + $0x130] sm:$0xff]   ;;  %v861_v22 = vsel %vm843_vm6, %v859_v8, %v860_v14  ;;  %2315 = vmatprep.mubr.bf16.mxu1 %v4261_v17  ;;  %3879 = vmatpush3.bf16.msra.mxu0 %v4252_v1 }
  0x3c   : > { %1009 = vst [vmem:[#allocation2 + $0xa0] sm:$0xf] %v3717_v60  ;;  %1078 = vst [vmem:[#allocation2 + $0x64] sm:$0xf] %v3717_v60  ;;  %v4263_v23 = vld [vmem:[#allocation2 + $0x50] ss:$36 sps:$4 sm:$0xff]   ;;  %v3733_v26 = vpack.c.bf16 %v861_v22, %v861_v22  ;;  %2218 = vmatprep.mubr.bf16.mxu0 %v4256_v2  ;;  %3880 = vmatprep.subr.bf16.mxu0 %v4258_v16 }
  0x3d   : > { %820 = vst [vmem:[#allocation2 + $0x100] sm:$0xf] %v3718_v61  ;;  %1010 = vst [vmem:[#allocation2 + $0xc4] sm:$0xf] %v3718_v61  ;;  %v4266_v24 = vld [vmem:[%s5523_s3 + $0x168] sm:$0xff]   ;;  %v863_v25 = vsel %vm843_vm6, %v860_v14, %v862_v20  ;;  %v541_v27 = vld [vmem:[%s4736_s27 + $0x60] sm:$0xff]  ;;  %2316 = vmatmul.mubr.bf16.gmra.mxu1 %v4263_v23 }
  0x3e   : > { %1079 = vst [vmem:[#allocation2 + $0x88] sm:$0xf] %v3718_v61  ;;  %953 = vst [vmem:[#allocation2 + $0xe0] sm:$0xf] %v3731_v3  ;;  %v4876_v28 = vld [vmem:[%s4736_s27 + $0x68] sm:$0xff]  ;;  %v3734_v29 = vpack.c.bf16 %v863_v25, %v863_v25  ;;  %v3706_v31 = vpack.c.bf16 %v541_v27, %v541_v27  ;;  %v730_v33 = vrot.slane %v541_v27, 1 }
  0x3f   : > { %1040 = vst [vmem:[#allocation2 + $0xa4] sm:$0xf] %v3731_v3  ;;  %1124 = vst [vmem:[#allocation2 + $0x68] sm:$0xf] %v3731_v3  ;;  %v4269_v30 = vld [vmem:[#allocation2 + $0x9c] ss:$36 sps:$4 sm:$0xff]   ;;  %v3707_v32 = vpack.c.bf16 %v4876_v28, %v4876_v28  ;;  %3881 = vmatpush3.bf16.msra.mxu0 %v4260_v21 }
  0x40   : > { %954 = vst [vmem:[#allocation2 + $0x104] sm:$0xf] %v3732_v11  ;;  %1041 = vst [vmem:[#allocation2 + $0xc8] sm:$0xf] %v3732_v11  ;;  %v731_v34 = vrot.slane %v4876_v28, 1  ;;  %v4268_v35 = vld [vmem:[%s5523_s3 + $0x128] sm:$0xff]   ;;  %2323 = vmatprep.mubr.bf16.mxu1 %v4269_v30  ;;  %3882 = vmatprep.subr.bf16.mxu0 %v4266_v24 }
  0x41   : > { %1125 = vst [vmem:[#allocation2 + $0x8c] sm:$0xf] %v3732_v11  ;;  %821 = vst [vmem:[#allocation2 + $0x124] sm:$0xf] %v3719_v18  ;;  %v864_v36 = vrot.slane %v541_v27, 2  ;;  %v865_v37 = vrot.slane %v4876_v28, 2 }
  0x42   : > { %822 = vst [vmem:[#allocation2 + $0x148] sm:$0xf] %v3720_v19  ;;  %1011 = vst [vmem:[#allocation2 + $0xe8] sm:$0xf] %v3719_v18  ;;  %v4259_v38 = vld [vmem:[#allocation2 + $0x48] ss:$36 sps:$4 sm:$0xff]   ;;  %v732_v40 = vsel %vm709_vm2, %v730_v33, %v731_v34 }
  0x43   : > { %1012 = vst [vmem:[#allocation2 + $0x10c] sm:$0xf] %v3720_v19  ;;  %1080 = vst [vmem:[#allocation2 + $0xac] sm:$0xf] %v3719_v18  ;;  %v4264_v39 = vld [vmem:[#allocation2 + $0x94] ss:$36 sps:$4 sm:$0xff]   ;;  %v3721_v42 = vpack.c.bf16 %v732_v40, %v732_v40  ;;  %v866_v43 = vsel %vm843_vm6, %v864_v36, %v865_v37  ;;  %2219 = vmatmul.mubr.bf16.gmra.mxu0 %v4259_v38 }
  0x44   : > { %1081 = vst [vmem:[#allocation2 + $0xd0] sm:$0xf] %v3720_v19  ;;  %955 = vst [vmem:[#allocation2 + $0x128] sm:$0xf] %v3733_v26  ;;  %v4290_v41 = vld [vmem:[%s5523_s3 + $0x1f0] sm:$0xff]   ;;  %v4274_v44 = vld [vmem:[%s5523_s3 + $0x160] sm:$0xff]   ;;  %v3735_v45 = vpack.c.bf16 %v866_v43, %v866_v43  ;;  %2226 = vmatprep.mubr.bf16.mxu0 %v4264_v39  ;;  %3883 = vmatpush3.bf16.msra.mxu0 %v4268_v35 }
  0x45   : > { %1042 = vst [vmem:[#allocation2 + $0xec] sm:$0xf] %v3733_v26  ;;  %1126 = vst [vmem:[#allocation2 + $0xb0] sm:$0xf] %v3733_v26  ;;  %v4271_v46 = vld [vmem:[#allocation2 + $0x98] ss:$36 sps:$4 sm:$0xff]   ;;  %3944 = vmatprep.subr.bf16.mxu1 %v4290_v41  ;;  %3884 = vmatprep.subr.bf16.mxu0 %v4274_v44 }
  0x46   : > { %956 = vst [vmem:[#allocation2 + $0x14c] sm:$0xf] %v3734_v29  ;;  %1043 = vst [vmem:[#allocation2 + $0x110] sm:$0xf] %v3734_v29  ;;  %v4276_v47 = vld [vmem:[%s5523_s3 + $0x120] sm:$0xff]   ;;  %v4291_v49 = vld [vmem:[%s5523_s3 + $0x1b0] sm:$0xff]   ;;  %2324 = vmatmul.mubr.bf16.gmra.mxu1 %v4271_v46 }
  0x47   : > { %1127 = vst [vmem:[#allocation2 + $0xd4] sm:$0xf] %v3734_v29  ;;  %979 = vst [vmem:[#allocation2 + $0x12c] sm:$0xf] %v3706_v31  ;;  %v4277_v48 = vld [vmem:[#allocation2 + $0xe4] ss:$36 sps:$4 sm:$0xff]   ;;  %3945 = vmatpush3.bf16.msra.mxu1 %v4291_v49 }
  0x48   : > { %980 = vst [vmem:[#allocation2 + $0x150] sm:$0xf] %v3707_v32  ;;  %647 = vst [vmem:[#allocation2 + $0x168] sm:$0xf] %v3706_v31  ;;  %v543_v50 = vld [vmem:[%s4736_s27 + $0x70] sm:$0x3]  ;;  %3885 = vmatpush3.bf16.msra.mxu0 %v4276_v47  ;;  %2331 = vmatprep.mubr.bf16.mxu1 %v4277_v48 }
  0x49   : > { %648 = vst [vmem:[#allocation2 + $0x18c] sm:$0xf] %v3707_v32  ;;  %1058 = vst [vmem:[#allocation2 + $0xf0] sm:$0xf] %v3706_v31  ;;  %v4267_v51 = vld [vmem:[#allocation2 + $0x90] ss:$36 sps:$4 sm:$0xff]  }
  0x4a   : > { %1059 = vst [vmem:[#allocation2 + $0x114] sm:$0xf] %v3707_v32  ;;  %823 = vst [vmem:[#allocation2 + $0x16c] sm:$0xf] %v3721_v42  ;;  %v4284_v52 = vld [vmem:[%s5523_s3 + $0x158] sm:$0xff]   ;;  %v733_v53 = vrot.slane %v543_v50, 1 }
  0x4b   : > { %1013 = vst [vmem:[#allocation2 + $0x130] sm:$0xf] %v3721_v42  ;;  %1082 = vst [vmem:[#allocation2 + $0xf4] sm:$0xf] %v3721_v42  ;;  %v4286_v54 = vld [vmem:[%s5523_s3 + $0x118] sm:$0xff]   ;;  %v867_v55 = vrot.slane %v543_v50, 2  ;;  %3886 = vmatprep.subr.bf16.mxu0 %v4284_v52  ;;  %2227 = vmatmul.mubr.bf16.gmra.mxu0 %v4267_v51 }
  0x4c   : > { %957 = vst [vmem:[#allocation2 + $0x170] sm:$0xf] %v3735_v45  ;;  %1044 = vst [vmem:[#allocation2 + $0x134] sm:$0xf] %v3735_v45  ;;  %v4272_v56 = vld [vmem:[#allocation2 + $0xdc] ss:$36 sps:$4 sm:$0xff]   ;;  %v734_v58 = vsel %vm709_vm2, %v731_v34, %v733_v53  ;;  %3887 = vmatpush3.bf16.msra.mxu0 %v4286_v54 }
  0x4d   : > { %1128 = vst [vmem:[#allocation2 + $0xf8] sm:$0xf] %v3735_v45  ;;  %v4294_v59 = vld [vmem:[%s5523_s3 + $0x150] sm:$0xff]   ;;  %v544_v60 = vld [vmem:[%s4736_s27 + $0x78] sm:$0xff]  ;;  %v3722_v61 = vpack.c.bf16 %v734_v58, %v734_v58  ;;  %v545_v62 = vld [vmem:[%s4736_s27 + $0x80] sm:$0xff]  ;;  %v868_v0 = vsel %vm843_vm6, %v865_v37, %v867_v55  ;;  %2234 = vmatprep.mubr.bf16.mxu0 %v4272_v56 }
  0x4e   : > { %v3708_v63 = vpack.c.bf16 %v544_v60, %v544_v60  ;;  %v735_v1 = vrot.slane %v544_v60, 1  ;;  %v4279_v2 = vld [vmem:[#allocation2 + $0xe0] ss:$36 sps:$4 sm:$0xff]   ;;  %v3709_v3 = vpack.c.bf16 %v545_v62, %v545_v62  ;;  %v3736_v4 = vpack.c.bf16 %v868_v0, %v868_v0  ;;  %v4300_v5 = vld [vmem:[%s5523_s3 + $0x1e8] sm:$0xff]   ;;  %v4296_v9 = vld [vmem:[%s5523_s3 + $0x110] sm:$0xff]   ;;  %3888 = vmatprep.subr.bf16.mxu0 %v4294_v59 }
  0x4f   : > { %v736_v6 = vrot.slane %v545_v62, 1  ;;  %v869_v7 = vrot.slane %v544_v60, 2  ;;  %v4287_v8 = vld [vmem:[#allocation2 + $0x12c] ss:$36 sps:$4 sm:$0xff]   ;;  %824 = vst [vmem:[#allocation2 + $0x190] sm:$0xf] %v3722_v61  ;;  %3946 = vmatprep.subr.bf16.mxu1 %v4300_v5  ;;  %2332 = vmatmul.mubr.bf16.gmra.mxu1 %v4279_v2 }
  0x50   : > { %1014 = vst [vmem:[#allocation2 + $0x154] sm:$0xf] %v3722_v61  ;;  %1083 = vst [vmem:[#allocation2 + $0x118] sm:$0xf] %v3722_v61  ;;  %v4301_v10 = vld [vmem:[%s5523_s3 + $0x1a8] sm:$0xff]   ;;  %v870_v11 = vrot.slane %v545_v62, 2  ;;  %2339 = vmatprep.mubr.bf16.mxu1 %v4287_v8  ;;  %3889 = vmatpush3.bf16.msra.mxu0 %v4296_v9 }
  0x51   : > { %981 = vst [vmem:[#allocation2 + $0x174] sm:$0xf] %v3708_v63  ;;  %649 = vst [vmem:[#allocation2 + $0x1b0] sm:$0xf] %v3708_v63  ;;  %v4302_v12 = vld [vmem:[%s5523_s3 + $0x1e0] sm:$0xff]   ;;  %v737_v14 = vsel %vm709_vm2, %v735_v1, %v736_v6  ;;  %v4305_v18 = vld [vmem:[%s5523_s3 + $0x148] sm:$0xff]   ;;  %3947 = vmatpush3.bf16.msra.mxu1 %v4301_v10 }
  0x52   : > { %1060 = vst [vmem:[#allocation2 + $0x138] sm:$0xf] %v3708_v63  ;;  %958 = vst [vmem:[#allocation2 + $0x194] sm:$0xf] %v3736_v4  ;;  %v546_v13 = vld [vmem:[%s4736_s27 + $0x88] sm:$0x3]  ;;  %v3723_v17 = vpack.c.bf16 %v737_v14, %v737_v14  ;;  %v871_v19 = vsel %vm843_vm6, %v869_v7, %v870_v11  ;;  %3948 = vmatprep.subr.bf16.mxu1 %v4302_v12  ;;  %3890 = vmatprep.subr.bf16.mxu0 %v4305_v18 }
  0x53   : > { %982 = vst [vmem:[#allocation2 + $0x198] sm:$0xf] %v3709_v3  ;;  %650 = vst [vmem:[#allocation2 + $0x1d4] sm:$0xf] %v3709_v3  ;;  %v738_v16 = vrot.slane %v546_v13, 1  ;;  %v4306_v21 = vld [vmem:[%s5523_s3 + $0x1a0] sm:$0xff]   ;;  %v3737_v23 = vpack.c.bf16 %v871_v19, %v871_v19 }
  0x54   : > { %1045 = vst [vmem:[#allocation2 + $0x158] sm:$0xf] %v3736_v4  ;;  %1061 = vst [vmem:[#allocation2 + $0x15c] sm:$0xf] %v3709_v3  ;;  %v4275_v20 = vld [vmem:[#allocation2 + $0xd8] ss:$36 sps:$4 sm:$0xff]  }
  0x55   : > { %1129 = vst [vmem:[#allocation2 + $0x11c] sm:$0xf] %v3736_v4  ;;  %v872_v22 = vrot.slane %v546_v13, 2  ;;  %v4282_v24 = vld [vmem:[#allocation2 + $0x124] ss:$36 sps:$4 sm:$0xff]   ;;  %v739_v25 = vsel %vm709_vm2, %v736_v6, %v738_v16  ;;  %v547_v28 = vld [vmem:[%s4736_s27 + $0x90] sm:$0xff]  ;;  %3949 = vmatpush3.bf16.msra.mxu1 %v4306_v21  ;;  %2235 = vmatmul.mubr.bf16.gmra.mxu0 %v4275_v20 }
  0x56   : > { %825 = vst [vmem:[#allocation2 + $0x1b4] sm:$0xf] %v3723_v17  ;;  %1015 = vst [vmem:[#allocation2 + $0x178] sm:$0xf] %v3723_v17  ;;  %v4308_v26 = vld [vmem:[%s5523_s3 + $0x108] sm:$0xff]   ;;  %v3724_v27 = vpack.c.bf16 %v739_v25, %v739_v25  ;;  %v4940_v29 = vld [vmem:[%s4736_s27 + $0x98] sm:$0xff]  ;;  %v3710_v31 = vpack.c.bf16 %v547_v28, %v547_v28  ;;  %2242 = vmatprep.mubr.bf16.mxu0 %v4282_v24 }
  0x57   : > { %1084 = vst [vmem:[#allocation2 + $0x13c] sm:$0xf] %v3723_v17  ;;  %v873_v30 = vsel %vm843_vm6, %v870_v11, %v872_v22  ;;  %959 = vst [vmem:[#allocation2 + $0x1b8] sm:$0xf] %v3737_v23  ;;  %v3711_v32 = vpack.c.bf16 %v4940_v29, %v4940_v29  ;;  %v4312_v34 = vld [vmem:[%s5523_s3 + $0x1d8] sm:$0xff]   ;;  %v740_v35 = vrot.slane %v547_v28, 1  ;;  %3891 = vmatpush3.bf16.msra.mxu0 %v4308_v26 }
  0x58   : > { %1046 = vst [vmem:[#allocation2 + $0x17c] sm:$0xf] %v3737_v23  ;;  %1130 = vst [vmem:[#allocation2 + $0x140] sm:$0xf] %v3737_v23  ;;  %v3738_v33 = vpack.c.bf16 %v873_v30, %v873_v30  ;;  %v741_v36 = vrot.slane %v4940_v29, 1  ;;  %3950 = vmatprep.subr.bf16.mxu1 %v4312_v34  ;;  %v874_v38 = vrot.slane %v547_v28, 2 }
  0x59   : > { %826 = vst [vmem:[#allocation2 + $0x1d8] sm:$0xf] %v3724_v27  ;;  %1016 = vst [vmem:[#allocation2 + $0x19c] sm:$0xf] %v3724_v27  ;;  %v4289_v37 = vld [vmem:[#allocation2 + $0x128] ss:$36 sps:$4 sm:$0xff]  }
  0x5a   : > { %1085 = vst [vmem:[#allocation2 + $0x160] sm:$0xf] %v3724_v27  ;;  %960 = vst [vmem:[#allocation2 + $0x1dc] sm:$0xf] %v3738_v33  ;;  %v875_v39 = vrot.slane %v4940_v29, 2  ;;  %v4313_v41 = vld [vmem:[%s5523_s3 + $0x198] sm:$0xff]   ;;  %v742_v42 = vsel %vm709_vm2, %v740_v35, %v741_v36  ;;  %2340 = vmatmul.mubr.bf16.gmra.mxu1 %v4289_v37 }
  0x5b   : > { %983 = vst [vmem:[#allocation2 + $0x1bc] sm:$0xf] %v3710_v31  ;;  %984 = vst [vmem:[#allocation2 + $0x1e0] sm:$0xf] %v3711_v32  ;;  %v4297_v40 = vld [vmem:[#allocation2 + $0x174] ss:$36 sps:$4 sm:$0xff]   ;;  %v3725_v44 = vpack.c.bf16 %v742_v42, %v742_v42  ;;  %3951 = vmatpush3.bf16.msra.mxu1 %v4313_v41 }
  0x5c   : > { %651 = vst [vmem:[#allocation2 + $0x1f8] sm:$0xf] %v3710_v31  ;;  %652 = vst [vmem:[#allocation2 + $0x21c] sm:$0xf] %v3711_v32  ;;  %v4314_v43 = vld [vmem:[%s5523_s3 + $0x1d0] sm:$0xff]   ;;  %v876_v45 = vsel %vm843_vm6, %v874_v38, %v875_v39  ;;  %v4317_v50 = vld [vmem:[%s5523_s3 + $0x140] sm:$0xff]   ;;  %2347 = vmatprep.mubr.bf16.mxu1 %v4297_v40 }
  0x5d   : > { %1047 = vst [vmem:[#allocation2 + $0x1a0] sm:$0xf] %v3738_v33  ;;  %1062 = vst [vmem:[#allocation2 + $0x180] sm:$0xf] %v3710_v31  ;;  %v4285_v46 = vld [vmem:[#allocation2 + $0x120] ss:$36 sps:$4 sm:$0xff]   ;;  %v3739_v48 = vpack.c.bf16 %v876_v45, %v876_v45  ;;  %3952 = vmatprep.subr.bf16.mxu1 %v4314_v43  ;;  %3892 = vmatprep.subr.bf16.mxu0 %v4317_v50 }
  0x5e   : > { %1063 = vst [vmem:[#allocation2 + $0x1a4] sm:$0xf] %v3711_v32  ;;  %1131 = vst [vmem:[#allocation2 + $0x164] sm:$0xf] %v3738_v33  ;;  %v549_v47 = vld [vmem:[%s4736_s27 + $0xa0] sm:$0x3]  ;;  %2243 = vmatmul.mubr.bf16.gmra.mxu0 %v4285_v46 }
  0x5f   : > { %v743_v49 = vrot.slane %v549_v47, 1  ;;  %827 = vst [vmem:[#allocation2 + $0x1fc] sm:$0xf] %v3725_v44  ;;  %1017 = vst [vmem:[#allocation2 + $0x1c0] sm:$0xf] %v3725_v44  ;;  %v4318_v51 = vld [vmem:[%s5523_s3 + $0x190] sm:$0xff]  }
  0x60   : > { %1086 = vst [vmem:[#allocation2 + $0x184] sm:$0xf] %v3725_v44  ;;  %v877_v52 = vrot.slane %v549_v47, 2  ;;  %961 = vst [vmem:[#allocation2 + $0x200] sm:$0xf] %v3739_v48  ;;  %3953 = vmatpush3.bf16.msra.mxu1 %v4318_v51  ;;  %v4320_v60 = vld [vmem:[%s5523_s3 + $0x100] sm:$0xff]  }
  0x61   : > { %1048 = vst [vmem:[#allocation2 + $0x1c4] sm:$0xf] %v3739_v48  ;;  %1132 = vst [vmem:[#allocation2 + $0x188] sm:$0xf] %v3739_v48  ;;  %v4292_v53 = vld [vmem:[#allocation2 + $0x16c] ss:$36 sps:$4 sm:$0xff]   ;;  %v744_v54 = vsel %vm709_vm2, %v741_v36, %v743_v49  ;;  %3893 = vmatpush3.bf16.msra.mxu0 %v4320_v60 }
  0x62   : > { %v4299_v55 = vld [vmem:[#allocation2 + $0x170] ss:$36 sps:$4 sm:$0xff]   ;;  %v3726_v56 = vpack.c.bf16 %v744_v54, %v744_v54  ;;  %v878_v58 = vsel %vm843_vm6, %v875_v39, %v877_v52  ;;  %v4309_v59 = vld [vmem:[#allocation2 + $0x1bc] ss:$36 sps:$4 sm:$0xff]   ;;  %v550_v62 = vld [vmem:[%s4736_s27 + $0xa8] sm:$0xff]  ;;  %2250 = vmatprep.mubr.bf16.mxu0 %v4292_v53 }
  0x63   : > { %v3740_v61 = vpack.c.bf16 %v878_v58, %v878_v58  ;;  %v4972_v63 = vld [vmem:[%s4736_s27 + $0xb0] sm:$0xff]  ;;  %v3741_v0 = vpack.c.bf16 %v550_v62, %v550_v62  ;;  %v4324_v2 = vld [vmem:[%s5523_s3 + $0x1c8] sm:$0xff]   ;;  %v990_v3 = vrot.slane %v550_v62, 1  ;;  %v1021_v6 = vrot.slane %v550_v62, 2  ;;  %v4326_v7 = vld [vmem:[%s5523_s3 + $0x1c0] sm:$0xff]   ;;  %2348 = vmatmul.mubr.bf16.gmra.mxu1 %v4299_v55 }
  0x64   : > { %828 = vst [vmem:[#allocation2 + $0x220] sm:$0xf] %v3726_v56  ;;  %1018 = vst [vmem:[#allocation2 + $0x1e4] sm:$0xf] %v3726_v56  ;;  %v3742_v1 = vpack.c.bf16 %v4972_v63, %v4972_v63  ;;  %v4325_v4 = vld [vmem:[%s5523_s3 + $0x188] sm:$0xff]   ;;  %v991_v5 = vrot.slane %v4972_v63, 1  ;;  %3954 = vmatprep.subr.bf16.mxu1 %v4324_v2  ;;  %2355 = vmatprep.mubr.bf16.mxu1 %v4309_v59 }
  0x65   : > { %1087 = vst [vmem:[#allocation2 + $0x1a8] sm:$0xf] %v3726_v56  ;;  %962 = vst [vmem:[#allocation2 + $0x224] sm:$0xf] %v3740_v61  ;;  %v1022_v8 = vrot.slane %v4972_v63, 2  ;;  %3955 = vmatpush3.bf16.msra.mxu1 %v4325_v4  ;;  %v4330_v14 = vld [vmem:[%s5523_s3 + $0x180] sm:$0xff]  }
  0x66   : > { %1049 = vst [vmem:[#allocation2 + $0x1e8] sm:$0xf] %v3740_v61  ;;  %1133 = vst [vmem:[#allocation2 + $0x1ac] sm:$0xf] %v3740_v61  ;;  %v4295_v9 = vld [vmem:[#allocation2 + $0x168] ss:$36 sps:$4 sm:$0xff]   ;;  %v992_v10 = vsel %vm709_vm2, %v990_v3, %v991_v5  ;;  %3956 = vmatprep.subr.bf16.mxu1 %v4326_v7 }
  0x67   : > { %985 = vst [vmem:[#allocation2 + $0x204] sm:$0xf] %v3741_v0  ;;  %986 = vst [vmem:[#allocation2 + $0x228] sm:$0xf] %v3742_v1  ;;  %v4303_v11 = vld [vmem:[#allocation2 + $0x1b4] ss:$36 sps:$4 sm:$0xff]   ;;  %v3743_v12 = vpack.c.bf16 %v992_v10, %v992_v10  ;;  %v1023_v13 = vsel %vm843_vm6, %v1021_v6, %v1022_v8  ;;  %2251 = vmatmul.mubr.bf16.gmra.mxu0 %v4295_v9 }
  0x68   : > { %1064 = vst [vmem:[#allocation2 + $0x1c8] sm:$0xf] %v3741_v0  ;;  %1065 = vst [vmem:[#allocation2 + $0x1ec] sm:$0xf] %v3742_v1  ;;  %v3745_v16 = vpack.c.bf16 %v1023_v13, %v1023_v13  ;;  %v4311_v17 = vld [vmem:[#allocation2 + $0x1b8] ss:$36 sps:$4 sm:$0xff]   ;;  %2258 = vmatprep.mubr.bf16.mxu0 %v4303_v11 }
  0x69   : > { %1088 = vst [vmem:[#allocation2 + $0x1cc] sm:$0xf] %v3743_v12  ;;  %1019 = vst [vmem:[#allocation2 + $0x208] sm:$0xf] %v3743_v12  ;;  %v4331_v18 = vld [vmem:[%s5523_s3 + $0x238] sm:$0xff]   ;;  %3957 = vmatpush3.bf16.msra.mxu1 %v4330_v14  ;;  %v4337_v31 = vld [vmem:[%s5523_s3 + $0x230] sm:$0xff]  }
  0x6a   : > { %1050 = vst [vmem:[#allocation2 + $0x20c] sm:$0xf] %v3745_v16  ;;  %1134 = vst [vmem:[#allocation2 + $0x1d0] sm:$0xf] %v3745_v16  ;;  %4054 = vmatprep.subr.bf16.mxu0 %v4331_v18  ;;  %v4307_v20 = vld [vmem:[#allocation2 + $0x1b0] ss:$36 sps:$4 sm:$0xff]  }
  0x6b   : > { %2356 = vmatmul.mubr.bf16.gmra.mxu1 %v4311_v17  ;;  %v4315_v21 = vld [vmem:[#allocation2 + $0x1fc] ss:$36 sps:$4 sm:$0xff]   ;;  %s567_s30 = scalar_select %p563_p11, 1, 0  ;;  %v4329_v25 = vld [vmem:[#allocation2 + $0x14] ss:$36 sps:$4 sm:$0xff]  }
  0x6c   : > { %v4323_v22 = vld [vmem:[#allocation2 + $0x200] ss:$36 sps:$4 sm:$0xff]   ;;  %v4319_v24 = vld [vmem:[#allocation2 + $0x1f8] ss:$36 sps:$4 sm:$0xff]   ;;  %v4327_v28 = vld [vmem:[#allocation2 + $0x10] ss:$36 sps:$4 sm:$0xff]  }
  0x6d   : > { %v4334_v23 = vld [vmem:[#allocation2 + $0x1c] ss:$36 sps:$4 sm:$0xff]   ;;  %v4339_v27 = vld [vmem:[#allocation2 + $0x64] ss:$36 sps:$4 sm:$0xff]   ;;  %v568_v29 = vstv %s567_s30  ;;  %s4382_s24 = scalar_select %p563_p11, 255, 0 }
  0x6e   : > { %v4321_v19 = vld [vmem:[#allocation2 + $0x204] ss:$36 sps:$4 sm:$0xff]   ;;  %v4332_v26 = vld [vmem:[#allocation2 + $0x18] ss:$36 sps:$4 sm:$0xff]   ;;  %vm569_vm9 = vcmp.eq.s32.totalorder %v568_v29, 1  ;;  %s3465_s30 = sshll.u32 %s4661_s22, 3 }
  0x6f   : > { %2363 = vmatprep.mubr.bf16.mxu1 %v4321_v19  ;;  %2259 = vmatmul.mubr.bf16.gmra.mxu0 %v4307_v20  ;;  %v4335_v30 = vld [vmem:[#allocation2 + $0x5c] ss:$36 sps:$4 sm:$0xff]   ;;  %v552_v33 = vld [vmem:[%s4736_s27 + $0xb8] sm:$0x3]  ;;  %v4344_v34 = vld [vmem:[%s5523_s3 + $0x228] sm:$0xff]   ;;  %s5420_s18 = scalar_lea.vmem %s5530_s10, %s3465_s30 }
  0x70   : > { %2266 = vmatprep.mubr.bf16.mxu0 %v4315_v21  ;;  %v4341_v32 = vld [vmem:[#allocation2 + $0x60] ss:$36 sps:$4 sm:$0xff]   ;;  %v993_v35 = vrot.slane %v552_v33, 1  ;;  %v1024_v36 = vrot.slane %v552_v33, 2  ;;  %v4346_v37 = vld [vmem:[#allocation2 + $0xac] ss:$36 sps:$4 sm:$0xff]  }
  0x71   : > { %v566_v38 = vld [vmem:[%s512_s23 + $0x10] sm:$0x3]  ;;  %v4383_v41 = vld [vmem:[%s512_s23] sm:%s4382_s24]  ;;  %v4338_v44 = vld [vmem:[#allocation2 + $0x58] ss:$36 sps:$4 sm:$0xff]  }
  0x72   : > { %v994_v39 = vsel %vm709_vm2, %v991_v5, %v993_v35  ;;  %v1025_v40 = vsel %vm843_vm6, %v1022_v8, %v1024_v36  ;;  %v4386_v42 = vld [vmem:[%s512_s23 + $0x8] sm:%s4382_s24]  ;;  %v572_v43 = vsel %vm569_vm9, %v566_v38, 0.0  ;;  %v3747_v47 = vpack.c.bf16 %v4383_v41, %v4383_v41  ;;  %v4351_v56 = vld [vmem:[%s5523_s3 + $0x220] sm:$0xff]   ;;  %v4353_v0 = vld [vmem:[#allocation2 + $0xf4] ss:$36 sps:$4 sm:$0xff]  }
  0x73   : > { %2364 = vmatmul.mubr.bf16.gmra.mxu1 %v4323_v22  ;;  %v3744_v45 = vpack.c.bf16 %v994_v39, %v994_v39  ;;  %v3746_v46 = vpack.c.bf16 %v1025_v40, %v1025_v40  ;;  %v3748_v48 = vpack.c.bf16 %v4386_v42, %v4386_v42  ;;  %v4342_v49 = vld [vmem:[#allocation2 + $0xa4] ss:$36 sps:$4 sm:$0xff]   ;;  %v3749_v50 = vpack.c.bf16 %v572_v43, %v572_v43  ;;  %v4358_v5 = vld [vmem:[%s5523_s3 + $0x218] sm:$0xff]   ;;  %v4349_v12 = vld [vmem:[#allocation2 + $0xec] ss:$36 sps:$4 sm:$0xff]  }
  0x74   : > { %2501 = vmatprep.mubr.bf16.mxu1 %v4334_v23  ;;  %1074 = vst [vmem:[#allocation2 + $0x210] sm:$0xf] %v3747_v47  ;;  %v1095_v51 = vshrl.u32 %v3747_v47, 16  ;;  %v1098_v52 = vshll.u32 %v3747_v47, 16  ;;  %v4348_v55 = vld [vmem:[#allocation2 + $0xa8] ss:$36 sps:$4 sm:$0xff]  }
  0x75   : > { %1089 = vst [vmem:[#allocation2 + $0x1f0] sm:$0xf] %v3744_v45  ;;  %1020 = vst [vmem:[#allocation2 + $0x22c] sm:$0xf] %v3744_v45  ;;  %v1104_v53 = vshll.u32 %v3748_v48, 16  ;;  %v1108_v54 = vshrl.u32 %v3748_v48, 16 }
  0x76   : > { %1051 = vst [vmem:[#allocation2 + $0x230] sm:$0xf] %v3746_v46  ;;  %1135 = vst [vmem:[#allocation2 + $0x1f4] sm:$0xf] %v3746_v46  ;;  %v1114_v58 = vshll.u32 %v3749_v50, 16  ;;  %v3521_v59 = vrot.slane %v3747_v47, 9 }
  0x77   : > { %2267 = vmatmul.mubr.bf16.gmra.mxu0 %v4319_v24  ;;  %1075 = vst [vmem:[#allocation2 + $0x234] sm:$0xf] %v3748_v48  ;;  %v1097_v60 = vrot.slane %v1095_v51, 4  ;;  %v1100_v61 = vrot.slane %v1098_v52, 5  ;;  %v1106_v62 = vrot.slane %v1104_v53, 5  ;;  %v1110_v63 = vrot.slane %v1108_v54, 4 }
  0x78   : > { %2404 = vmatprep.mubr.bf16.mxu0 %v4329_v25  ;;  %v1138_v1 = vrot.slane %v3748_v48, 5  ;;  %v1116_v4 = vrot.slane %v1114_v58, 5  ;;  %v1141_v10 = vrot.slane %v3749_v50, 5  ;;  %v4345_v11 = vld [vmem:[#allocation2 + $0xa0] ss:$36 sps:$4 sm:$0xff]   ;;  %v4372_v20 = vld [vmem:[%s5523_s3 + $0x208] sm:$0xff]  }
  0x79   : > { %v1101_v2 = vor.u32 %v1100_v61, %v1097_v60  ;;  %v1111_v3 = vor.u32 %v1110_v63, %v1106_v62  ;;  %v4355_v17 = vld [vmem:[#allocation2 + $0xf0] ss:$36 sps:$4 sm:$0xff]   ;;  %v4360_v19 = vld [vmem:[#allocation2 + $0x13c] ss:$36 sps:$4 sm:$0xff]   ;;  %v4352_v15 = vld [vmem:[#allocation2 + $0xe8] ss:$36 sps:$4 sm:$0xff]  }
  0x7a   : > { %v1139_v6 = vsel %vm4768_vm7, %v3521_v59, %v1138_v1  ;;  %v1140_v9 = vrot.slane %v1138_v1, 4  ;;  %v4356_v57 = vld [vmem:[#allocation2 + $0x134] ss:$36 sps:$4 sm:$0xff]   ;;  %v4379_v22 = vld [vmem:[%s5523_s3 + $0x200] sm:$0xff]   ;;  %v4395_v41 = vld [vmem:[#allocation2 + $0x188] ss:$36 sps:$4 sm:$0xff]  }
  0x7b   : > { %2502 = vmatmul.mubr.bf16.vlgmr.msra.gmra.mxu1 %v4332_v26  ;;  %v1102_v7 = vrot.slane %v1101_v2, 4  ;;  %v1112_v8 = vrot.slane %v1111_v3, 4  ;;  %1145 = vst [vmem:[#allocation2 + $0x218] sm:$0xf] %v1139_v6  ;;  %v4362_v21 = vld [vmem:[#allocation2 + $0x138] ss:$36 sps:$4 sm:$0xff]  }
  0x7c   : > { %2509 = vmatprep.mubr.bf16.mxu1 %v4339_v27  ;;  %v1142_v16 = vsel %vm4768_vm7, %v1140_v9, %v1141_v10  ;;  %v4367_v23 = vld [vmem:[#allocation2 + $0x184] ss:$36 sps:$4 sm:$0xff]   ;;  %v4359_v24 = vld [vmem:[#allocation2 + $0x130] ss:$36 sps:$4 sm:$0xff]   ;;  %v4363_v25 = vld [vmem:[#allocation2 + $0x17c] ss:$36 sps:$4 sm:$0xff]  }
  0x7d   : > { %v1107_v13 = vsel %vm4794_vm8, %v1102_v7, %v1106_v62  ;;  %v1117_v14 = vsel %vm4794_vm8, %v1112_v8, %v1116_v4  ;;  %1146 = vst [vmem:[#allocation2 + $0x23c] sm:$0xf] %v1142_v16  ;;  %v4369_v26 = vld [vmem:[#allocation2 + $0x180] ss:$36 sps:$4 sm:$0xff]   ;;  %v4374_v27 = vld [vmem:[#allocation2 + $0x1cc] ss:$36 sps:$4 sm:$0xff]  }
  0x7e   : > { %1120 = vst [vmem:[#allocation2 + $0x214] sm:$0xf] %v1107_v13  ;;  %1121 = vst [vmem:[#allocation2 + $0x238] sm:$0xf] %v1117_v14  ;;  %v4370_v29 = vld [vmem:[#allocation2 + $0x1c4] ss:$36 sps:$4 sm:$0xff]  }
  0x7f   : > { %2405 = vmatmul.mubr.bf16.vlgmr.msra.gmra.mxu0 %v4327_v28  ;;  %v4366_v28 = vld [vmem:[#allocation2 + $0x178] ss:$36 sps:$4 sm:$0xff]   ;;  %v4377_v33 = vld [vmem:[#allocation2 + $0x20c] ss:$36 sps:$4 sm:$0xff]   ;;  %v4390_v36 = vld [vmem:[#allocation2 + $0x20] ss:$36 sps:$4 sm:$0xff]  }
  0x80   : > { %4055 = vmatpush3.bf16.msra.mxu0 %v4331_v18  ;;  %2412 = vmatprep.mubr.bf16.mxu0 %v4335_v30  ;;  %v4365_v18 = vld [vmem:[%s5523_s3 + $0x210] sm:$0xff]   ;;  %v4376_v30 = vld [vmem:[#allocation2 + $0x1c8] ss:$36 sps:$4 sm:$0xff]   ;;  %v4393_v39 = vld [vmem:[#allocation2 + $0xf8] ss:$36 sps:$4 sm:$0xff]  }
  0x81   : > { %4056 = vmatprep.subr.bf16.mxu0 %v4337_v31  ;;  %v4380_v35 = vld [vmem:[#allocation2 + $0x208] ss:$36 sps:$4 sm:$0xff]   ;;  %v4392_v38 = vld [vmem:[#allocation2 + $0xb0] ss:$36 sps:$4 sm:$0xff]   ;;  %v4394_v40 = vld [vmem:[#allocation2 + $0x140] ss:$36 sps:$4 sm:$0xff]  }
  0x82   : > { %v4396_v42 = vld [vmem:[#allocation2 + $0x1d0] ss:$36 sps:$4 sm:$0xff]   ;;  %v4398_v43 = vld [vmem:[%s5525_s5 + $0x38] sm:$0xff]   ;;  %v4400_v46 = vld [vmem:[%s5525_s5 + $0x28] sm:$0xff]  }
  0x83   : > { %2510 = vmatmul.mubr.bf16.gmra.mxu1 %v4341_v32  ;;  %v4373_v32 = vld [vmem:[#allocation2 + $0x1c0] ss:$36 sps:$4 sm:$0xff]   ;;  %4086 = vmatprep.subr.bf16.mxu1 %v4398_v43  ;;  %v4399_v45 = vld [vmem:[%s5525_s5 + $0x30] sm:$0xff]   ;;  %v4402_v48 = vld [vmem:[%s5525_s5 + $0x18] sm:$0xff]  }
  0x84   : > { %4057 = vmatpush3.bf16.msra.mxu0 %v4337_v31  ;;  %2517 = vmatprep.mubr.bf16.mxu1 %v4346_v37  ;;  %v4391_v37 = vld [vmem:[#allocation2 + $0x68] ss:$36 sps:$4 sm:$0xff]   ;;  %v4401_v47 = vld [vmem:[%s5525_s5 + $0x20] sm:$0xff]  }
  0x85   : > { %4058 = vmatprep.subr.bf16.mxu0 %v4344_v34  ;;  %v4387_v31 = vld [vmem:[#allocation2 + $0x214] ss:$36 sps:$4 sm:$0xff]   ;;  %4087 = vmatpush3.bf16.msra.mxu1 %v4398_v43  ;;  %v4404_v51 = vld [vmem:[%s5525_s5 + $0x8] sm:$0xff]   ;;  %v4405_v62 = vld [vmem:[%s5525_s5] sm:$0xff]  }
  0x86   : > { %4088 = vmatprep.subr.bf16.mxu1 %v4399_v45 }
  0x87   : > { %2413 = vmatmul.mubr.bf16.gmra.mxu0 %v4338_v44  ;;  %v4397_v44 = vld [vmem:[#allocation2 + $0x218] ss:$36 sps:$4 sm:$0xff]  }
  0x88   : > { %2420 = vmatprep.mubr.bf16.mxu0 %v4342_v49  ;;  %4059 = vmatpush3.bf16.msra.mxu0 %v4344_v34  ;;  %v4389_v34 = vld [vmem:[#allocation2 + $0x210] ss:$36 sps:$4 sm:$0xff]  }
  0x89   : > { %4060 = vmatprep.subr.bf16.mxu0 %v4351_v56  ;;  %4089 = vmatpush3.bf16.msra.mxu1 %v4399_v45  ;;  %v4403_v49 = vld [vmem:[%s5525_s5 + $0x10] sm:$0xff]  }
  0x8a   : > { %4090 = vmatprep.subr.bf16.mxu1 %v4400_v46 }
  0x8b   : > { %2518 = vmatmul.mubr.bf16.gmra.mxu1 %v4348_v55 }
  0x8c   : > { %4061 = vmatpush3.bf16.msra.mxu0 %v4351_v56  ;;  %2525 = vmatprep.mubr.bf16.mxu1 %v4353_v0  ;;  %v5070_v56 = vld [vmem:[%s5524_s4] ss:$0 sm:$0xff] }
  0x8d   : > { %4062 = vmatprep.subr.bf16.mxu0 %v4358_v5  ;;  %4091 = vmatpush3.bf16.msra.mxu1 %v4400_v46 }
  0x8e   : > { %4092 = vmatprep.subr.bf16.mxu1 %v4401_v47 }
  0x8f   : > { %2421 = vmatmul.mubr.bf16.gmra.mxu0 %v4345_v11 }
  0x90   : > { %2428 = vmatprep.mubr.bf16.mxu0 %v4349_v12  ;;  %4063 = vmatpush3.bf16.msra.mxu0 %v4358_v5 }
  0x91   : > { %4064 = vmatprep.subr.bf16.mxu0 %v4365_v18  ;;  %4093 = vmatpush3.bf16.msra.mxu1 %v4401_v47 }
  0x92   : > { %4094 = vmatprep.subr.bf16.mxu1 %v4402_v48 }
  0x93   : > { %2526 = vmatmul.mubr.bf16.gmra.mxu1 %v4355_v17 }
  0x94   : > { %2533 = vmatprep.mubr.bf16.mxu1 %v4360_v19  ;;  %4065 = vmatpush3.bf16.msra.mxu0 %v4365_v18 }
  0x95   : > { %4066 = vmatprep.subr.bf16.mxu0 %v4372_v20  ;;  %4095 = vmatpush3.bf16.msra.mxu1 %v4402_v48 }
  0x96   : > { %4096 = vmatprep.subr.bf16.mxu1 %v4403_v49 }
  0x97   : > { %2429 = vmatmul.mubr.bf16.gmra.mxu0 %v4352_v15 }
  0x98   : > { %2436 = vmatprep.mubr.bf16.mxu0 %v4356_v57  ;;  %4067 = vmatpush3.bf16.msra.mxu0 %v4372_v20 }
  0x99   : > { %4068 = vmatprep.subr.bf16.mxu0 %v4379_v22  ;;  %4097 = vmatpush3.bf16.msra.mxu1 %v4403_v49 }
  0x9a   : > { %4098 = vmatprep.subr.bf16.mxu1 %v4404_v51 }
  0x9b   : > { %2534 = vmatmul.mubr.bf16.gmra.mxu1 %v4362_v21 }
  0x9c   : > { %2541 = vmatprep.mubr.bf16.mxu1 %v4367_v23  ;;  %4069 = vmatpush3.bf16.msra.mxu0 %v4379_v22 }
  0x9d   : > { %4099 = vmatpush3.bf16.msra.mxu1 %v4404_v51 }
  0x9e   : > { %4100 = vmatprep.subr.bf16.mxu1 %v4405_v62 }
  0x9f   : > { %2437 = vmatmul.mubr.bf16.gmra.mxu0 %v4359_v24 }
  0xa0   : > { %2444 = vmatprep.mubr.bf16.mxu0 %v4363_v25 }
  0xa1   : > { %4101 = vmatpush3.bf16.msra.mxu1 %v4405_v62 }
  0xa3   : > { %2542 = vmatmul.mubr.bf16.gmra.mxu1 %v4369_v26 }
  0xa4   : > { %2549 = vmatprep.mubr.bf16.mxu1 %v4374_v27 }
  0xa7   : > { %2445 = vmatmul.mubr.bf16.gmra.mxu0 %v4366_v28 }
  0xa8   : > { %2452 = vmatprep.mubr.bf16.mxu0 %v4370_v29 }
  0xab   : > { %2550 = vmatmul.mubr.bf16.gmra.mxu1 %v4376_v30 }
  0xac   : > { %2557 = vmatprep.mubr.bf16.mxu1 %v4387_v31 }
  0xaf   : > { %2453 = vmatmul.mubr.bf16.gmra.mxu0 %v4373_v32 }
  0xb0   : > { %2460 = vmatprep.mubr.bf16.mxu0 %v4377_v33 }
  0xb3   : > { %2558 = vmatmul.mubr.bf16.gmra.mxu1 %v4389_v34 }
  0xb7   : > { %2461 = vmatmul.mubr.bf16.gmra.mxu0 %v4380_v35 }
  0xb8   : > { %4070 = vmatprep.mubr.bf16.mxu0 %v4390_v36 }
  0xbf   : > { %4071 = vmatmul.mubr.bf16.vlgmr.msra.gmra.mxu0 %v4391_v37 }
  0xc0   : > { %4074 = vmatprep.mubr.bf16.mxu0 %v4392_v38 }
  0xc7   : > { %4075 = vmatmul.mubr.bf16.gmra.mxu0 %v4393_v39 }
  0xc8   : > { %4078 = vmatprep.mubr.bf16.mxu0 %v4394_v40 }
  0xcf   : > { %4079 = vmatmul.mubr.bf16.gmra.mxu0 %v4395_v41 }
  0xd0   : > { %4082 = vmatprep.mubr.bf16.mxu0 %v4396_v42 }
  0xd7   : > { %4083 = vmatmul.mubr.bf16.gmra.mxu0 %v4397_v44 }
  0xf4   : > { %v3830_v50 = vpop.f32.mrf.mxu1 }
  0xf6   : > { %v3831_v52 = vpop.f32.mrf.mxu1 }
  0xf7   : > { %v3832_v53 = vadd.f32 %v3831_v52, %v3830_v50 }
  0xf8   : > { %v3833_v55 = vpop.f32.mrf.mxu1 }
  0xfa   : > { %v3766_v54 = vpop.f32.mrf.mxu0  ;;  %v3834_v59 = vpop.f32.mrf.mxu1 }
  0xfb   : > { %v3835_v61 = vadd.f32 %v3834_v59, %v3833_v55 }
  0xfc   : > { %v3767_v58 = vpop.f32.mrf.mxu0 }
  0xfd   : > { %v3768_v60 = vadd.f32 %v3767_v58, %v3766_v54  ;;  %v3836_v0 = vpop.f32.mrf.mxu1 }
  0xfe   : > { %v3769_v63 = vpop.f32.mrf.mxu0 }
  0xff   : > { %v2213_v1 = vadd.f32 %v3768_v60, %v5070_v56  ;;  %v3837_v3 = vpop.f32.mrf.mxu1 }
 0x100   : > { %v3770_v2 = vpop.f32.mrf.mxu0  ;;  %v3838_v6 = vadd.f32 %v3837_v3, %v3836_v0 }
 0x101   : > { %v5076_v4 = vadd.f32 %v3832_v53, %v2213_v1  ;;  %v3771_v5 = vadd.f32 %v3770_v2, %v3769_v63  ;;  %v3839_v8 = vpop.f32.mrf.mxu1 }
 0x103   : > { %v3772_v7 = vpop.f32.mrf.mxu0  ;;  %v2216_v9 = vadd.f32 %v3771_v5, %v5070_v56  ;;  %v3840_v11 = vpop.f32.mrf.mxu1 }
 0x104   : > { %v3841_v14 = vadd.f32 %v3840_v11, %v3839_v8 }
 0x105   : > { %v3773_v10 = vpop.f32.mrf.mxu0  ;;  %v5079_v12 = vadd.f32 %v3835_v61, %v2216_v9 }
 0x106   : > { %v3774_v13 = vadd.f32 %v3773_v10, %v3772_v7  ;;  %v3842_v17 = vpop.f32.mrf.mxu1 }
 0x107   : > { %v3775_v16 = vpop.f32.mrf.mxu0 }
 0x108   : > { %v2221_v18 = vadd.f32 %v3774_v13, %v5070_v56  ;;  %v3843_v20 = vpop.f32.mrf.mxu1 }
 0x109   : > { %v3776_v19 = vpop.f32.mrf.mxu0  ;;  %v3844_v21 = vadd.f32 %v3843_v20, %v3842_v17 }
 0x10a   : > { %v5082_v15 = vadd.f32 %v3838_v6, %v2221_v18  ;;  %v3777_v57 = vadd.f32 %v3776_v19, %v3775_v16  ;;  %v3845_v23 = vpop.f32.mrf.mxu1 }
 0x10b   : > { %v3778_v22 = vpop.f32.mrf.mxu0 }
 0x10c   : > { %v2224_v24 = vadd.f32 %v3777_v57, %v5070_v56  ;;  %v3846_v26 = vpop.f32.mrf.mxu1 }
 0x10d   : > { %v3779_v25 = vpop.f32.mrf.mxu0  ;;  %v3847_v29 = vadd.f32 %v3846_v26, %v3845_v23 }
 0x10e   : > { %v5085_v27 = vadd.f32 %v3841_v14, %v2224_v24  ;;  %v3780_v28 = vadd.f32 %v3779_v25, %v3778_v22 }
 0x10f   : > { %v3781_v30 = vpop.f32.mrf.mxu0  ;;  %v3848_v31 = vpop.f32.mrf.mxu1 }
 0x110   : > { %v2229_v32 = vadd.f32 %v3780_v28, %v5070_v56 }
 0x111   : > { %v3782_v33 = vpop.f32.mrf.mxu0  ;;  %v3849_v34 = vpop.f32.mrf.mxu1 }
 0x112   : > { %v5088_v35 = vadd.f32 %v3844_v21, %v2229_v32  ;;  %v3783_v36 = vadd.f32 %v3782_v33, %v3781_v30  ;;  %v3850_v37 = vadd.f32 %v3849_v34, %v3848_v31 }
 0x113   : > { %v3851_v39 = vpop.f32.mrf.mxu1 }
 0x114   : > { %v2232_v40 = vadd.f32 %v3783_v36, %v5070_v56 }
 0x115   : > { %v3784_v38 = vpop.f32.mrf.mxu0  ;;  %v3852_v42 = vpop.f32.mrf.mxu1 }
 0x116   : > { %v5091_v43 = vadd.f32 %v3847_v29, %v2232_v40  ;;  %v3853_v45 = vadd.f32 %v3852_v42, %v3851_v39 }
 0x117   : > { %v3785_v41 = vpop.f32.mrf.mxu0 }
 0x118   : > { %v3786_v44 = vadd.f32 %v3785_v41, %v3784_v38 }
 0x119   : > { %v3787_v46 = vpop.f32.mrf.mxu0 }
 0x11a   : > { %v3854_v47 = vpop.f32.mrf.mxu1  ;;  %v2237_v48 = vadd.f32 %v3786_v44, %v5070_v56 }
 0x11b   : > { %v3788_v49 = vpop.f32.mrf.mxu0 }
 0x11c   : > { %v3855_v50 = vpop.f32.mrf.mxu1  ;;  %v5094_v51 = vadd.f32 %v3850_v37, %v2237_v48  ;;  %v3789_v52 = vadd.f32 %v3788_v49, %v3787_v46 }
 0x11d   : > { %v3856_v53 = vadd.f32 %v3855_v50, %v3854_v47 }
 0x11e   : > { %v3790_v54 = vpop.f32.mrf.mxu0  ;;  %v3857_v55 = vpop.f32.mrf.mxu1  ;;  %v2240_v58 = vadd.f32 %v3789_v52, %v5070_v56 }
 0x120   : > { %v3791_v59 = vpop.f32.mrf.mxu0  ;;  %v3858_v60 = vpop.f32.mrf.mxu1  ;;  %v5097_v61 = vadd.f32 %v3853_v45, %v2240_v58 }
 0x121   : > { %v3792_v62 = vadd.f32 %v3791_v59, %v3790_v54  ;;  %v3859_v63 = vadd.f32 %v3858_v60, %v3857_v55 }
 0x122   : > { %v3793_v0 = vpop.f32.mrf.mxu0 }
 0x123   : > { %v3860_v1 = vpop.f32.mrf.mxu1  ;;  %v2245_v2 = vadd.f32 %v3792_v62, %v5070_v56 }
 0x124   : > { %v3794_v3 = vpop.f32.mrf.mxu0 }
 0x125   : > { %v3861_v5 = vpop.f32.mrf.mxu1  ;;  %v5100_v6 = vadd.f32 %v3856_v53, %v2245_v2  ;;  %v3795_v7 = vadd.f32 %v3794_v3, %v3793_v0 }
 0x126   : > { %v3862_v8 = vadd.f32 %v3861_v5, %v3860_v1 }
 0x127   : > { %5538 = vst [vmem:[#allocation5_spill] sm:$0xff] %v5100_v6  ;;  %v3796_v9 = vpop.f32.mrf.mxu0  ;;  %v3863_v10 = vpop.f32.mrf.mxu1  ;;  %v2248_v11 = vadd.f32 %v3795_v7, %v5070_v56 }
 0x129   : > { %v3797_v13 = vpop.f32.mrf.mxu0  ;;  %v3864_v14 = vpop.f32.mrf.mxu1  ;;  %v5103_v16 = vadd.f32 %v3859_v63, %v2248_v11 }
 0x12a   : > { %v3798_v17 = vadd.f32 %v3797_v13, %v3796_v9  ;;  %v3865_v18 = vadd.f32 %v3864_v14, %v3863_v10 }
 0x12b   : > { %5539 = vst [vmem:[#allocation6_spill] sm:$0xff] %v5103_v16  ;;  %v3799_v19 = vpop.f32.mrf.mxu0  ;;  %v3866_v20 = vpop.f32.mrf.mxu1 }
 0x12c   : > { %v2253_v57 = vadd.f32 %v3798_v17, %v5070_v56 }
 0x12d   : > { %v3800_v21 = vpop.f32.mrf.mxu0  ;;  %v3867_v22 = vpop.f32.mrf.mxu1 }
 0x12e   : > { %v5106_v23 = vadd.f32 %v3862_v8, %v2253_v57  ;;  %v3801_v24 = vadd.f32 %v3800_v21, %v3799_v19  ;;  %v3868_v25 = vadd.f32 %v3867_v22, %v3866_v20 }
 0x12f   : > { %v3802_v26 = vpop.f32.mrf.mxu0  ;;  %v3869_v28 = vpop.f32.mrf.mxu1 }
 0x130   : > { %v2256_v29 = vadd.f32 %v3801_v24, %v5070_v56 }
 0x131   : > { %v3803_v30 = vpop.f32.mrf.mxu0  ;;  %v3870_v31 = vpop.f32.mrf.mxu1 }
 0x132   : > { %v5109_v32 = vadd.f32 %v3865_v18, %v2256_v29  ;;  %v3804_v33 = vadd.f32 %v3803_v30, %v3802_v26  ;;  %v3871_v34 = vadd.f32 %v3870_v31, %v3869_v28 }
 0x133   : > { %v3805_v36 = vpop.f32.mrf.mxu0  ;;  %v3872_v37 = vpop.f32.mrf.mxu1 }
 0x134   : > { %5540 = vst [vmem:[#allocation7_spill] sm:$0xff] %v5109_v32  ;;  %v2261_v38 = vadd.f32 %v3804_v33, %v5070_v56 }
 0x135   : > { %v3806_v39 = vpop.f32.mrf.mxu0  ;;  %v3873_v40 = vpop.f32.mrf.mxu1 }
 0x136   : > { %v5112_v41 = vadd.f32 %v3868_v25, %v2261_v38  ;;  %v3807_v42 = vadd.f32 %v3806_v39, %v3805_v36  ;;  %v3874_v44 = vadd.f32 %v3873_v40, %v3872_v37 }
 0x137   : > { %v3808_v45 = vpop.f32.mrf.mxu0  ;;  %v5114_v46 = vpop.f32.mrf.mxu1 }
 0x138   : > { %5541 = vst [vmem:[#allocation8_spill] sm:$0xff] %v5112_v41  ;;  %v2264_v47 = vadd.f32 %v3807_v42, %v5070_v56 }
 0x139   : > { %v3809_v48 = vpop.f32.mrf.mxu0  ;;  %v5117_v49 = vpop.f32.mrf.mxu1 }
 0x13a   : > { %v5119_v50 = vadd.f32 %v3871_v34, %v2264_v47  ;;  %v3810_v52 = vadd.f32 %v3809_v48, %v3808_v45 }
 0x13b   : > { %v3811_v53 = vpop.f32.mrf.mxu0  ;;  %v5121_v54 = vpop.f32.mrf.mxu1 }
 0x13c   : > { %5542 = vst [vmem:[#allocation9_spill] sm:$0xff] %v5119_v50  ;;  %v2269_v55 = vadd.f32 %v3810_v52, %v5070_v56 }
 0x13d   : > { %v3812_v58 = vpop.f32.mrf.mxu0  ;;  %v5124_v59 = vpop.f32.mrf.mxu1 }
 0x13e   : > { %v5126_v60 = vadd.f32 %v3874_v44, %v2269_v55  ;;  %v5128_v62 = vadd.f32 %v3812_v58, %v3811_v53 }
 0x13f   : > { %v3894_v63 = vpop.f32.mrf.mxu0  ;;  %v5130_v0 = vpop.f32.mrf.mxu1 }
 0x140   : > { %5543 = vst [vmem:[#allocation10_spill] sm:$0xff] %v5126_v60 }
 0x141   : > { %v3895_v1 = vpop.f32.mrf.mxu0  ;;  %v5132_v2 = vpop.f32.mrf.mxu1 }
 0x142   : > { %v3896_v3 = vadd.f32 %v3895_v1, %v3894_v63 }
 0x143   : > { %v3897_v5 = vpop.f32.mrf.mxu0  ;;  %v3964_v7 = vpop.f32.mrf.mxu1 }
 0x144   : > { %v5135_v8 = vadd.f32 %v3896_v3, %v5076_v4 }
 0x145   : > { %v3898_v9 = vpop.f32.mrf.mxu0  ;;  %v3965_v10 = vpop.f32.mrf.mxu1 }
 0x147   : > { %v3900_v11 = vpop.f32.mrf.mxu0  ;;  %v3967_v13 = vpop.f32.mrf.mxu1 }
 0x149   : > { %v3901_v14 = vpop.f32.mrf.mxu0  ;;  %v3968_v17 = vpop.f32.mrf.mxu1 }
 0x14a   : > { %v3902_v6 = vadd.f32 %v3901_v14, %v3900_v11 }
 0x14b   : > { %v3903_v18 = vpop.f32.mrf.mxu0  ;;  %v5137_v19 = vpop.f32.mrf.mxu1 }
 0x14d   : > { %v3904_v20 = vpop.f32.mrf.mxu0  ;;  %v5139_v57 = vpop.f32.mrf.mxu1 }
 0x14e   : > { %v3905_v32 = vadd.f32 %v3904_v20, %v3903_v18 }
 0x14f   : > { %v3906_v21 = vpop.f32.mrf.mxu0  ;;  %v5141_v22 = vpop.f32.mrf.mxu1 }
 0x151   : > { %v3907_v24 = vpop.f32.mrf.mxu0  ;;  %v5143_v25 = vpop.f32.mrf.mxu1 }
 0x153   : > { %v3909_v4 = vpop.f32.mrf.mxu0  ;;  %v3976_v26 = vpop.f32.mrf.mxu1 }
 0x155   : > { %v3910_v28 = vpop.f32.mrf.mxu0  ;;  %v3977_v29 = vpop.f32.mrf.mxu1 }
 0x157   : > { %v3912_v30 = vpop.f32.mrf.mxu0  ;;  %v3979_v31 = vpop.f32.mrf.mxu1 }
 0x159   : > { %v3913_v33 = vpop.f32.mrf.mxu0  ;;  %v3980_v34 = vpop.f32.mrf.mxu1 }
 0x15a   : > { %v3914_v14 = vadd.f32 %v3913_v33, %v3912_v30 }
 0x15b   : > { %v3915_v36 = vpop.f32.mrf.mxu0  ;;  %v5145_v37 = vpop.f32.mrf.mxu1 }
 0x15c   : > { %5544 = vst [vmem:[#allocation11_spill] sm:$0xff] %v5145_v37 }
 0x15d   : > { %v3916_v38 = vpop.f32.mrf.mxu0  ;;  %v5147_v39 = vpop.f32.mrf.mxu1 }
 0x15e   : > { %5545 = vst [vmem:[#allocation12_spill] sm:$0xff] %v5147_v39  ;;  %v3917_v20 = vadd.f32 %v3916_v38, %v3915_v36 }
 0x15f   : > { %v5149_v40 = vpop.f32.mrf.mxu0  ;;  %v5151_v42 = vpop.f32.mrf.mxu1 }
 0x160   : > { %5546 = vst [vmem:[#allocation13_spill] sm:$0xff] %v5151_v42  ;;  %v2434_v30 = vadd.f32 %v3917_v20, %v5097_v61 }
 0x161   : > { %v5153_v44 = vpop.f32.mrf.mxu0  ;;  %v5155_v45 = vpop.f32.mrf.mxu1 }
 0x162   : > { %5547 = vst [vmem:[#allocation14_spill] sm:$0xff] %v5155_v45 }
 0x163   : > { %v5157_v47 = vpop.f32.mrf.mxu0  ;;  %v5161_v52 = vpop.f32.mrf.mxu1  ;;  %v5565_v20 = vld [vmem:[#allocation11_spill] sm:$0xff] }
 0x164   : > { %5548 = vst [vmem:[#allocation15_spill] sm:$0xff] %v5161_v52  ;;  %v3969_v52 = vadd.f32 %v3968_v17, %v3967_v13  ;;  %v3911_v13 = vadd.f32 %v3910_v28, %v3909_v4  ;;  %v3978_v17 = vadd.f32 %v3977_v29, %v3976_v26 }
 0x165   : > { %v5159_v48 = vpop.f32.mrf.mxu0  ;;  %v5163_v58 = vpop.f32.mrf.mxu1 }
 0x166   : > { %5549 = vst [vmem:[#allocation16_spill] sm:$0xff] %v5163_v58 }
 0x167   : > { %v3924_v53 = vpop.f32.mrf.mxu0  ;;  %v5165_v3 = vpop.f32.mrf.mxu1 }
 0x168   : > { %5550 = vst [vmem:[#allocation17_spill] sm:$0xff] %v5165_v3  ;;  %v3899_v3 = vadd.f32 %v3898_v9, %v3897_v5  ;;  %v3963_v5 = vadd.f32 %v5132_v2, %v5130_v0  ;;  %v3981_v0 = vadd.f32 %v3980_v34, %v3979_v31 }
 0x169   : > { %v3925_v55 = vpop.f32.mrf.mxu0  ;;  %v5171_v60 = vpop.f32.mrf.mxu1 }
 0x16a   : > { %5553 = vst [vmem:[#allocation20_spill] sm:$0xff] %v5171_v60  ;;  %v2415_v60 = vadd.f32 %v3902_v6, %v5082_v15  ;;  %v2410_v11 = vadd.f32 %v3899_v3, %v5079_v12  ;;  %v2431_v12 = vadd.f32 %v3914_v14, %v5094_v51  ;;  %v3975_v51 = vadd.f32 %v5143_v25, %v5141_v22  ;;  %v5563_v3 = vld [vmem:[#allocation7_spill] sm:$0xff]  ;;  %v5564_v14 = vld [vmem:[#allocation5_spill] sm:$0xff] }
 0x16b   : > { %v3927_v63 = vpop.f32.mrf.mxu0  ;;  %v5177_v16 = vpop.f32.mrf.mxu1  ;;  %v3926_v26 = vadd.f32 %v3925_v55, %v3924_v53  ;;  %v2531_v34 = vadd.f32 %v3981_v0, %v2434_v30  ;;  %v5559_v55 = vld [vmem:[#allocation15_spill] sm:$0xff] }
 0x16c   : > { %5556 = vst [vmem:[#allocation23_spill] sm:$0xff] %v5177_v16  ;;  %v2528_v31 = vadd.f32 %v3978_v17, %v2431_v12 }
 0x16d   : > { %v3928_v1 = vpop.f32.mrf.mxu0  ;;  %v5183_v58 = vpop.f32.mrf.mxu1  ;;  %v2447_v53 = vadd.f32 %v3926_v26, %v5106_v23 }
 0x16e   : > { %5558 = vst [vmem:[#allocation25_spill] sm:$0xff] %v5183_v58  ;;  %v3929_v29 = vadd.f32 %v3928_v1, %v3927_v63  ;;  %v5560_v63 = vld [vmem:[#allocation16_spill] sm:$0xff] }
 0x16f   : > { %v5167_v50 = vpop.f32.mrf.mxu0  ;;  %v5191_v16 = vpop.f32.mrf.mxu1 }
 0x170   : > { %5551 = vst [vmem:[#allocation18_spill] sm:$0xff] %v5167_v50 }
 0x171   : > { %v5169_v41 = vpop.f32.mrf.mxu0  ;;  %v5198_v58 = vpop.f32.mrf.mxu1  ;;  %v5562_v1 = vld [vmem:[#allocation20_spill] sm:$0xff] }
 0x172   : > { %5552 = vst [vmem:[#allocation19_spill] sm:$0xff] %v5169_v41 }
 0x173   : > { %v5173_v45 = vpop.f32.mrf.mxu0  ;;  %v4000_v33 = vpop.f32.mrf.mxu1 }
 0x174   : > { %5554 = vst [vmem:[#allocation21_spill] sm:$0xff] %v5173_v45  ;;  %v3966_v45 = vadd.f32 %v3965_v10, %v3964_v7  ;;  %v2507_v7 = vadd.f32 %v3963_v5, %v2410_v11  ;;  %v3908_v10 = vadd.f32 %v3907_v24, %v3906_v21  ;;  %v2426_v24 = vadd.f32 %v3911_v13, %v5091_v43 }
 0x175   : > { %v5175_v42 = vpop.f32.mrf.mxu0  ;;  %v4001_v61 = vpop.f32.mrf.mxu1 }
 0x176   : > { %5555 = vst [vmem:[#allocation22_spill] sm:$0xff] %v5175_v42  ;;  %v2418_v42 = vadd.f32 %v3905_v32, %v5085_v27  ;;  %v2512_v15 = vadd.f32 %v3966_v45, %v2415_v60  ;;  %v2423_v21 = vadd.f32 %v3908_v10, %v5088_v35  ;;  %v3923_v35 = vadd.f32 %v5159_v48, %v5157_v47 }
 0x177   : > { %v5179_v39 = vpop.f32.mrf.mxu0  ;;  %v2523_v45 = vadd.f32 %v3975_v51, %v2426_v24  ;;  %v2450_v47 = vadd.f32 %v3929_v29, %v5563_v3  ;;  %v4003_v48 = vpop.f32.mrf.mxu1 }
 0x178   : > { %v2515_v6 = vadd.f32 %v3969_v52, %v2418_v42  ;;  %v3877_v42 = vadd.f32 %v5117_v49, %v5114_v46  ;;  %v2272_v52 = vadd.f32 %v5128_v62, %v5070_v56  ;;  %v3990_v46 = vadd.f32 %v5560_v63, %v5559_v55  ;;  %v5561_v49 = vld [vmem:[#allocation17_spill] sm:$0xff]  ;;  %v5567_v62 = vld [vmem:[#allocation6_spill] sm:$0xff] }
 0x179   : > { %v5181_v37 = vpop.f32.mrf.mxu0  ;;  %v2442_v23 = vadd.f32 %v3923_v35, %v5567_v62  ;;  %v4004_v17 = vpop.f32.mrf.mxu1  ;;  %v3999_v63 = vadd.f32 %v5198_v58, %v5191_v16  ;;  %v4406_v16 = vld [vmem:[%s5527_s7 + $0x38] sm:$0xff]   ;;  %v4407_v58 = vld [vmem:[%s5527_s7 + $0x30] sm:$0xff]   ;;  %v4412_v62 = vld [vmem:[%s5527_s7 + $0x8] sm:$0xff]  }
 0x17a   : > { %5557 = vst [vmem:[#allocation24_spill] sm:$0xff] %v5181_v37  ;;  %v3960_v37 = vadd.f32 %v5124_v59, %v5121_v54  ;;  %v2544_v0 = vadd.f32 %v3990_v46, %v2447_v53  ;;  %v2369_v30 = vadd.f32 %v3877_v42, %v2272_v52  ;;  %v5579_v53 = vld [vmem:[#allocation9_spill] sm:$0xff]  ;;  %4118 = vmatprep.subr.bf16.mxu0 %v4406_v16 }
 0x17b   : > { %v5185_v50 = vpop.f32.mrf.mxu0  ;;  %v5573_v24 = vld [vmem:[#allocation21_spill] sm:$0xff]  ;;  %4150 = vmatprep.subr.bf16.mxu1 %v4406_v16  ;;  %4119 = vmatpush3.bf16.msra.mxu0 %v4406_v16 }
 0x17c   : > { %v2504_v27 = vadd.f32 %v3960_v37, %v5135_v8  ;;  %v3972_v8 = vadd.f32 %v5139_v57, %v5137_v19  ;;  %v3920_v19 = vadd.f32 %v5153_v44, %v5149_v40  ;;  %v3993_v40 = vadd.f32 %v5562_v1, %v5561_v49  ;;  %4120 = vmatprep.subr.bf16.mxu0 %v4407_v58 }
 0x17d   : > { %v5187_v41 = vpop.f32.mrf.mxu0  ;;  %v5574_v51 = vld [vmem:[#allocation22_spill] sm:$0xff] }
 0x17e   : > { %v2520_v22 = vadd.f32 %v3972_v8, %v2423_v21  ;;  %v3941_v12 = vadd.f32 %v5187_v41, %v5185_v50  ;;  %v5571_v8 = vld [vmem:[#allocation18_spill] sm:$0xff]  ;;  %v4002_v41 = vadd.f32 %v4001_v61, %v4000_v33  ;;  %v4005_v50 = vadd.f32 %v4004_v17, %v4003_v48 }
 0x17f   : > { %v4072_v9 = vpop.f32.mrf.mxu0  ;;  %4121 = vmatpush3.bf16.msra.mxu0 %v4407_v58 }
 0x180   : > { %v2609_v54 = vadd.f32 %v4072_v9, %v2512_v15  ;;  %v5566_v15 = vld [vmem:[#allocation12_spill] sm:$0xff] }
 0x181   : > { %v2600_v18 = vpop.f32.mrf.mxu0  ;;  %v3984_v56 = vadd.f32 %v5566_v15, %v5565_v20  ;;  %v5570_v13 = vld [vmem:[#allocation24_spill] sm:$0xff]  ;;  %v4409_v20 = vld [vmem:[%s5527_s7 + $0x20] sm:$0xff]  }
 0x182   : > { %v2601_v36 = vadd.f32 %v2600_v18, %v2504_v27  ;;  %v2439_v18 = vadd.f32 %v3920_v19, %v5564_v14  ;;  %v5569_v27 = vld [vmem:[#allocation14_spill] sm:$0xff]  ;;  %v4410_v15 = vld [vmem:[%s5527_s7 + $0x18] sm:$0xff]  }
 0x183   : > { %v4073_v32 = vpop.f32.mrf.mxu0 }
 0x184   : > { %v2612_v59 = vadd.f32 %v4073_v32, %v2515_v6  ;;  %v5568_v6 = vld [vmem:[#allocation13_spill] sm:$0xff] }
 0x185   : > { %v2603_v2 = vpop.f32.mrf.mxu0  ;;  %v3987_v32 = vadd.f32 %v5569_v27, %v5568_v6  ;;  %v5271_v6 = vld [vmem:[%s5526_s6] ss:$0 sm:$0xff] }
 0x186   : > { %v2664_v38 = vpack.c.bf16 %v2612_v59, %v2609_v54  ;;  %v2604_v60 = vadd.f32 %v2603_v2, %v2507_v7  ;;  %v3938_v54 = vadd.f32 %v5570_v13, %v5179_v39  ;;  %v2547_v2 = vadd.f32 %v3993_v40, %v2450_v47 }
 0x187   : > { %v4076_v37 = vpop.f32.mrf.mxu0 }
 0x188   : > { %v2663_v4 = vpack.c.bf16 %v2604_v60, %v2601_v36  ;;  %v2625_v57 = vadd.f32 %v4076_v37, %v2528_v31  ;;  %v2536_v36 = vadd.f32 %v3984_v56, %v2439_v18  ;;  %v2539_v60 = vadd.f32 %v3987_v32, %v2442_v23  ;;  %v5572_v37 = vld [vmem:[#allocation19_spill] sm:$0xff]  ;;  %v4408_v18 = vld [vmem:[%s5527_s7 + $0x28] sm:$0xff]   ;;  %v4413_v23 = vld [vmem:[%s5527_s7] sm:$0xff]  }
 0x189   : > { %v2616_v28 = vpop.f32.mrf.mxu0  ;;  %v3932_v21 = vadd.f32 %v5572_v37, %v5571_v8  ;;  %4122 = vmatprep.subr.bf16.mxu0 %v4408_v18  ;;  %v4411_v56 = vld [vmem:[%s5527_s7 + $0x10] sm:$0xff]  }
 0x18a   : > { %4102 = vmatprep.mubr.bf16.mxu1 %v2663_v4  ;;  %v2617_v11 = vadd.f32 %v2616_v28, %v2520_v22  ;;  %v3935_v4 = vadd.f32 %v5574_v51, %v5573_v24  ;;  %v5575_v28 = vld [vmem:[#allocation10_spill] sm:$0xff]  ;;  %4123 = vmatpush3.bf16.msra.mxu0 %v4408_v18 }
 0x18b   : > { %v4077_v43 = vpop.f32.mrf.mxu0  ;;  %4103 = vmatmul.mubr.bf16.vlgmr.msra.gmra.mxu1 %v2664_v38  ;;  %v2463_v29 = vadd.f32 %v3938_v54, %v5575_v28  ;;  %4124 = vmatprep.subr.bf16.mxu0 %v4409_v20 }
 0x18c   : > { %v2628_v25 = vadd.f32 %v4077_v43, %v2531_v34  ;;  %v2466_v34 = vadd.f32 %v3941_v12, %v2369_v30  ;;  %v5576_v43 = vld [vmem:[#allocation23_spill] sm:$0xff]  ;;  %v2458_v55 = vadd.f32 %v3935_v4, %v5579_v53  ;;  %4158 = vmatpush3.bf16.msra.mxu1 %v4406_v16 }
 0x18d   : > { %v2619_v44 = vpop.f32.mrf.mxu0  ;;  %v2560_v33 = vadd.f32 %v4002_v41, %v2463_v29  ;;  %4151 = vmatprep.subr.bf16.mxu1 %v4407_v58 }
 0x18e   : > { %v2666_v5 = vpack.c.bf16 %v2628_v25, %v2625_v57  ;;  %v2620_v9 = vadd.f32 %v2619_v44, %v2523_v45  ;;  %v5577_v57 = vld [vmem:[#allocation25_spill] sm:$0xff]  ;;  %v5578_v45 = vld [vmem:[#allocation8_spill] sm:$0xff]  ;;  %v2563_v61 = vadd.f32 %v4005_v50, %v2466_v34  ;;  %v2555_v47 = vadd.f32 %v3999_v63, %v2458_v55  ;;  %4125 = vmatpush3.bf16.msra.mxu0 %v4409_v20 }
 0x18f   : > { %v4080_v7 = vpop.f32.mrf.mxu0  ;;  %v3996_v22 = vadd.f32 %v5577_v57, %v5576_v43  ;;  %v2455_v52 = vadd.f32 %v3932_v21, %v5578_v45  ;;  %4126 = vmatprep.subr.bf16.mxu0 %v4410_v15 }
 0x190   : > { %v2665_v10 = vpack.c.bf16 %v2620_v9, %v2617_v11  ;;  %v2641_v39 = vadd.f32 %v4080_v7, %v2544_v0  ;;  %4159 = vmatpush3.bf16.msra.mxu1 %v4407_v58 }
 0x191   : > { %v2632_v59 = vpop.f32.mrf.mxu0  ;;  %v2552_v44 = vadd.f32 %v3996_v22, %v2455_v52  ;;  %4152 = vmatprep.subr.bf16.mxu1 %v4408_v18 }
 0x192   : > { %4106 = vmatprep.mubr.bf16.mxu1 %v2665_v10  ;;  %v2633_v19 = vadd.f32 %v2632_v59, %v2536_v36  ;;  %4127 = vmatpush3.bf16.msra.mxu0 %v4410_v15 }
 0x193   : > { %v4081_v38 = vpop.f32.mrf.mxu0  ;;  %4107 = vmatmul.mubr.bf16.gmra.mxu1 %v2666_v5  ;;  %4128 = vmatprep.subr.bf16.mxu0 %v4411_v56 }
 0x194   : > { %v2644_v26 = vadd.f32 %v4081_v38, %v2547_v2  ;;  %4160 = vmatpush3.bf16.msra.mxu1 %v4408_v18 }
 0x195   : > { %v2635_v31 = vpop.f32.mrf.mxu0  ;;  %4153 = vmatprep.subr.bf16.mxu1 %v4409_v20 }
 0x196   : > { %v2668_v42 = vpack.c.bf16 %v2644_v26, %v2641_v39  ;;  %v2636_v35 = vadd.f32 %v2635_v31, %v2539_v60  ;;  %4129 = vmatpush3.bf16.msra.mxu0 %v4411_v56 }
 0x197   : > { %v4084_v25 = vpop.f32.mrf.mxu0  ;;  %4130 = vmatprep.subr.bf16.mxu0 %v4412_v62 }
 0x198   : > { %v2667_v46 = vpack.c.bf16 %v2636_v35, %v2633_v19  ;;  %v2657_v40 = vadd.f32 %v4084_v25, %v2560_v33  ;;  %4161 = vmatpush3.bf16.msra.mxu1 %v4409_v20 }
 0x199   : > { %v2648_v49 = vpop.f32.mrf.mxu0  ;;  %4154 = vmatprep.subr.bf16.mxu1 %v4410_v15 }
 0x19a   : > { %4110 = vmatprep.mubr.bf16.mxu1 %v2667_v46  ;;  %v2649_v11 = vadd.f32 %v2648_v49, %v2552_v44  ;;  %4131 = vmatpush3.bf16.msra.mxu0 %v4412_v62 }
 0x19b   : > { %v4085_v1 = vpop.f32.mrf.mxu0  ;;  %4111 = vmatmul.mubr.bf16.gmra.mxu1 %v2668_v42  ;;  %4132 = vmatprep.subr.bf16.mxu0 %v4413_v23 }
 0x19c   : > { %v2660_v3 = vadd.f32 %v4085_v1, %v2563_v61  ;;  %4162 = vmatpush3.bf16.msra.mxu1 %v4410_v15 }
 0x19d   : > { %v2651_v48 = vpop.f32.mrf.mxu0  ;;  %4155 = vmatprep.subr.bf16.mxu1 %v4411_v56 }
 0x19e   : > { %v2670_v5 = vpack.c.bf16 %v2660_v3, %v2657_v40  ;;  %v2652_v9 = vadd.f32 %v2651_v48, %v2555_v47  ;;  %4133 = vmatpush3.bf16.msra.mxu0 %v4413_v23 }
 0x1a0   : > { %v2669_v14 = vpack.c.bf16 %v2652_v9, %v2649_v11  ;;  %4163 = vmatpush3.bf16.msra.mxu1 %v4411_v56 }
 0x1a1   : > { %4156 = vmatprep.subr.bf16.mxu1 %v4412_v62 }
 0x1a2   : > { %4114 = vmatprep.mubr.bf16.mxu1 %v2669_v14 }
 0x1a3   : > { %4115 = vmatmul.mubr.bf16.gmra.mxu1 %v2670_v5 }
 0x1a4   : > { %4164 = vmatpush3.bf16.msra.mxu1 %v4412_v62 }
 0x1a5   : > { %4157 = vmatprep.subr.bf16.mxu1 %v4413_v23 }
 0x1a8   : > { %4165 = vmatpush3.bf16.msra.mxu1 %v4413_v23 }
 0x24b   : > { %v4104_v27 = vpop.f32.mrf.mxu1 }
 0x24c   : > { %v5274_v32 = vadd.f32 %v4104_v27, %v5271_v6 }
 0x24d   : > { %v2776_v7 = vpop.f32.mrf.mxu1 }
 0x24e   : > { %v2857_v10 = vmul.f32 0.044715, %v5274_v32  ;;  %v5278_v13 = vadd.f32 %v5271_v6, %v2776_v7 }
 0x24f   : > { %v4105_v54 = vpop.f32.mrf.mxu1 }
 0x250   : > { %v2873_v59 = vmul.f32 %v2857_v10, %v5274_v32  ;;  %v2855_v12 = vmul.f32 0.044715, %v5278_v13  ;;  %v5283_v17 = vadd.f32 %v4105_v54, %v5271_v6 }
 0x251   : > { %v2779_v0 = vpop.f32.mrf.mxu1 }
 0x252   : > { %v2889_v2 = vmul.f32 %v2873_v59, %v5274_v32  ;;  %v2871_v30 = vmul.f32 %v2855_v12, %v5278_v13  ;;  %v2858_v36 = vmul.f32 0.044715, %v5283_v17  ;;  %v5289_v38 = vadd.f32 %v5271_v6, %v2779_v0 }
 0x253   : > { %v4108_v60 = vpop.f32.mrf.mxu1 }
 0x254   : > { %v2905_v8 = vadd.f32 %v2889_v2, %v5274_v32  ;;  %v2887_v37 = vmul.f32 %v2871_v30, %v5278_v13  ;;  %v2874_v21 = vmul.f32 %v2858_v36, %v5283_v17  ;;  %v5295_v24 = vadd.f32 %v4108_v60, %v5271_v6 }
 0x255   : > { %v2856_v51 = vmul.f32 0.044715, %v5289_v38  ;;  %v2792_v4 = vpop.f32.mrf.mxu1 }
 0x256   : > { %v2921_v39 = vmul.f32 0.7978846, %v2905_v8  ;;  %v2890_v26 = vmul.f32 %v2874_v21, %v5283_v17  ;;  %v2861_v28 = vmul.f32 0.044715, %v5295_v24  ;;  %v5301_v29 = vadd.f32 %v5271_v6, %v2792_v4 }
 0x257   : > { %v2872_v41 = vmul.f32 %v2856_v51, %v5289_v38  ;;  %v4109_v50 = vpop.f32.mrf.mxu1  ;;  %v2903_v31 = vadd.f32 %v2887_v37, %v5278_v13  ;;  %v2841_v8 = vmul.f32 0.5, %v5274_v32  ;;  %v2839_v32 = vmul.f32 0.5, %v5278_v13 }
 0x258   : > { %v2906_v34 = vadd.f32 %v2890_v26, %v5283_v17  ;;  %v2877_v19 = vmul.f32 %v2861_v28, %v5295_v24  ;;  %v2859_v42 = vmul.f32 0.044715, %v5301_v29  ;;  %4414 = vtanh.f32 %v2921_v39 }
 0x259   : > { %v2888_v35 = vmul.f32 %v2872_v41, %v5289_v38  ;;  %v5310_v43 = vadd.f32 %v4109_v50, %v5271_v6  ;;  %v2795_v57 = vpop.f32.mrf.mxu1  ;;  %v2919_v22 = vmul.f32 0.7978846, %v2903_v31  ;;  %v2842_v50 = vmul.f32 0.5, %v5283_v17 }
 0x25a   : > { %v2922_v25 = vmul.f32 0.7978846, %v2906_v34  ;;  %v2893_v45 = vmul.f32 %v2877_v19, %v5295_v24  ;;  %v2875_v52 = vmul.f32 %v2859_v42, %v5301_v29  ;;  %v5315_v53 = vadd.f32 %v5271_v6, %v2795_v57 }
 0x25b   : > { %v2862_v55 = vmul.f32 0.044715, %v5310_v43  ;;  %v4112_v63 = vpop.f32.mrf.mxu1  ;;  %v2904_v46 = vadd.f32 %v2888_v35, %v5289_v38  ;;  %4416 = vtanh.f32 %v2919_v22  ;;  %v2840_v57 = vmul.f32 0.5, %v5289_v38 }
 0x25c   : > { %4418 = vtanh.f32 %v2922_v25  ;;  %v2891_v49 = vmul.f32 %v2875_v52, %v5301_v29  ;;  %v2860_v33 = vmul.f32 0.044715, %v5315_v53  ;;  %v5322_v61 = vadd.f32 %v4112_v63, %v5271_v6 }
 0x25d   : > { %v2878_v1 = vmul.f32 %v2862_v55, %v5310_v43  ;;  %v2808_v40 = vpop.f32.mrf.mxu1  ;;  %v2920_v44 = vmul.f32 0.7978846, %v2904_v46  ;;  %v2909_v3 = vadd.f32 %v2893_v45, %v5295_v24 }
 0x25e   : > { %v2876_v47 = vmul.f32 %v2860_v33, %v5315_v53  ;;  %v2865_v48 = vmul.f32 0.044715, %v5322_v61  ;;  %v5329_v11 = vadd.f32 %v5271_v6, %v2808_v40  ;;  %v2907_v14 = vadd.f32 %v2891_v49, %v5301_v29 }
 0x25f   : > { %v2894_v5 = vmul.f32 %v2878_v1, %v5310_v43  ;;  %v4113_v9 = vpop.f32.mrf.mxu1  ;;  %4420 = vtanh.f32 %v2920_v44  ;;  %v2925_v16 = vmul.f32 0.7978846, %v2909_v3 }
 0x260   : > { %v2892_v58 = vmul.f32 %v2876_v47, %v5315_v53  ;;  %v2881_v18 = vmul.f32 %v2865_v48, %v5322_v61  ;;  %v2863_v20 = vmul.f32 0.044715, %v5329_v11  ;;  %v5337_v15 = vadd.f32 %v4113_v9, %v5271_v6 }
 0x261   : > { %v2811_v56 = vpop.f32.mrf.mxu1  ;;  %v2923_v62 = vmul.f32 0.7978846, %v2907_v14  ;;  %v2910_v23 = vadd.f32 %v2894_v5, %v5310_v43  ;;  %4422 = vtanh.f32 %v2925_v16 }
 0x262   : > { %v2897_v27 = vmul.f32 %v2881_v18, %v5322_v61  ;;  %v2879_v7 = vmul.f32 %v2863_v20, %v5329_v11  ;;  %v2866_v10 = vmul.f32 0.044715, %v5337_v15  ;;  %v5344_v54 = vadd.f32 %v5271_v6, %v2811_v56 }
 0x263   : > { %v4116_v59 = vpop.f32.mrf.mxu1  ;;  %v2908_v12 = vadd.f32 %v2892_v58, %v5315_v53  ;;  %4424 = vtanh.f32 %v2923_v62  ;;  %v2926_v0 = vmul.f32 0.7978846, %v2910_v23 }
 0x264   : > { %v2913_v2 = vadd.f32 %v2897_v27, %v5322_v61  ;;  %v2895_v30 = vmul.f32 %v2879_v7, %v5329_v11  ;;  %v2882_v36 = vmul.f32 %v2866_v10, %v5337_v15  ;;  %v5351_v60 = vadd.f32 %v4116_v59, %v5271_v6 }
 0x265   : > { %v2864_v37 = vmul.f32 0.044715, %v5344_v54  ;;  %v2824_v21 = vpop.f32.mrf.mxu1  ;;  %v2924_v51 = vmul.f32 0.7978846, %v2908_v12  ;;  %4426 = vtanh.f32 %v2926_v0  ;;  %v4415_v4 = vpop.eup %4414 }
 0x266   : > { %v2929_v39 = vmul.f32 0.7978846, %v2913_v2  ;;  %v2898_v26 = vmul.f32 %v2882_v36, %v5337_v15  ;;  %v2869_v28 = vmul.f32 0.044715, %v5351_v60  ;;  %v5358_v41 = vadd.f32 %v5271_v6, %v2824_v21 }
 0x267   : > { %v2880_v31 = vmul.f32 %v2864_v37, %v5344_v54  ;;  %v4117_v34 = vpop.f32.mrf.mxu1  ;;  %4428 = vtanh.f32 %v2924_v51  ;;  %v2911_v22 = vadd.f32 %v2895_v30, %v5329_v11  ;;  %v2953_v55 = vadd.f32 1.0, %v4415_v4 }
 0x268   : > { %v4417_v19 = vpop.eup %4416  ;;  %v2914_v42 = vadd.f32 %v2898_v26, %v5337_v15  ;;  %v2867_v35 = vmul.f32 0.044715, %v5358_v41  ;;  %4430 = vtanh.f32 %v2929_v39  ;;  %v5369_v17 = vadd.f32 %v4117_v34, %v5271_v6 }
 0x269   : > { %v4419_v25 = vpop.eup %4418  ;;  %v2896_v45 = vmul.f32 %v2880_v31, %v5344_v54  ;;  %v2827_v52 = vpop.f32.mrf.mxu1  ;;  %v2885_v63 = vmul.f32 %v2869_v28, %v5351_v60  ;;  %v2951_v33 = vadd.f32 1.0, %v4417_v19  ;;  %v2927_v48 = vmul.f32 0.7978846, %v2911_v22 }
 0x26a   : > { %v2930_v13 = vmul.f32 0.7978846, %v2914_v42  ;;  %v2883_v46 = vmul.f32 %v2867_v35, %v5358_v41  ;;  %v5374_v49 = vadd.f32 %v5271_v6, %v2827_v52  ;;  %v2870_v38 = vmul.f32 0.044715, %v5369_v17 }
 0x26b   : > { %v2954_v1 = vadd.f32 1.0, %v4419_v25  ;;  %v2912_v40 = vadd.f32 %v2896_v45, %v5344_v54  ;;  %v2901_v6 = vmul.f32 %v2885_v63, %v5351_v60  ;;  %v2967_v56 = vmul.f32 %v2951_v33, %v2839_v32 }
 0x26c   : > { %v4421_v44 = vpop.eup %4420  ;;  %4432 = vtanh.f32 %v2930_v13  ;;  %v2899_v3 = vmul.f32 %v2883_v46, %v5358_v41  ;;  %v2868_v47 = vmul.f32 0.044715, %v5374_v49  ;;  %v2886_v5 = vmul.f32 %v2870_v38, %v5369_v17 }
 0x26d   : > { %v2952_v9 = vadd.f32 1.0, %v4421_v44  ;;  %v2970_v14 = vmul.f32 %v2954_v1, %v2842_v50  ;;  %v2928_v16 = vmul.f32 0.7978846, %v2912_v40  ;;  %4434 = vtanh.f32 %v2927_v48 }
 0x26e   : > { %v2884_v58 = vmul.f32 %v2868_v47, %v5374_v49  ;;  %v4423_v18 = vpop.eup %4422  ;;  %v2902_v20 = vmul.f32 %v2886_v5, %v5369_v17  ;;  %v2969_v23 = vmul.f32 %v2953_v55, %v2841_v8  ;;  %v2915_v10 = vadd.f32 %v2899_v3, %v5358_v41 }
 0x26f   : > { %v2968_v62 = vmul.f32 %v2952_v9, %v2840_v57  ;;  %4436 = vtanh.f32 %v2928_v16  ;;  %v2917_v36 = vadd.f32 %v2901_v6, %v5351_v60  ;;  %v2846_v8 = vmul.f32 0.5, %v5310_v43 }
 0x270   : > { %v4425_v27 = vpop.eup %4424  ;;  %v2900_v7 = vmul.f32 %v2884_v58, %v5374_v49  ;;  %v2984_v12 = vpack.c.bf16 %v2970_v14, %v2969_v23  ;;  %v2931_v30 = vmul.f32 0.7978846, %v2915_v10  ;;  %v2918_v37 = vadd.f32 %v2902_v20, %v5369_v17 }
 0x271   : > { %v2983_v59 = vpack.c.bf16 %v2968_v62, %v2967_v56  ;;  %v2955_v21 = vadd.f32 1.0, %v4425_v27  ;;  %v2957_v51 = vadd.f32 1.0, %v4423_v18  ;;  %v2933_v28 = vmul.f32 0.7978846, %v2917_v36 }
 0x272   : > { %v4427_v0 = vpop.eup %4426  ;;  %v2916_v2 = vadd.f32 %v2900_v7, %v5374_v49  ;;  %4438 = vtanh.f32 %v2931_v30  ;;  %v2934_v50 = vmul.f32 0.7978846, %v2918_v37  ;;  %v2843_v31 = vmul.f32 0.5, %v5301_v29 }
 0x273   : > { %4134 = vmatprep.mubr.bf16.mxu0 %v2983_v59  ;;  %v2958_v4 = vadd.f32 1.0, %v4427_v0  ;;  %v2844_v34 = vmul.f32 0.5, %v5315_v53  ;;  %v2845_v42 = vmul.f32 0.5, %v5295_v24  ;;  %v2850_v63 = vmul.f32 0.5, %v5337_v15 }
 0x274   : > { %v4429_v39 = vpop.eup %4428  ;;  %4135 = vmatmul.mubr.bf16.vlgmr.msra.gmra.mxu0 %v2984_v12  ;;  %v2932_v26 = vmul.f32 0.7978846, %v2916_v2  ;;  %v2971_v57 = vmul.f32 %v2955_v21, %v2843_v31  ;;  %v2847_v24 = vmul.f32 0.5, %v5329_v11  ;;  %v2848_v38 = vmul.f32 0.5, %v5344_v54  ;;  %v4447_v31 = vld [vmem:[%s4736_s27] sm:$0xff] }
 0x275   : > { %v2956_v32 = vadd.f32 1.0, %v4429_v39  ;;  %v4431_v19 = vpop.eup %4430  ;;  %v2974_v35 = vmul.f32 %v2958_v4, %v2846_v8  ;;  %v2973_v22 = vmul.f32 %v2957_v51, %v2845_v42  ;;  %v2849_v1 = vmul.f32 0.5, %v5322_v61  ;;  %v4446_v51 = vld [vmem:[%s4736_s27 + $0x18] sm:$0xff] }
 0x276   : > { %4440 = vtanh.f32 %v2932_v26  ;;  %v2961_v46 = vadd.f32 1.0, %v4431_v19  ;;  %v2851_v15 = vmul.f32 0.5, %v5358_v41  ;;  %v2852_v11 = vmul.f32 0.5, %v5374_v49  ;;  %v5404_v41 = vld [vmem:[%s5528_s8] ss:$0 sm:$0xff] }
 0x277   : > { %v2972_v43 = vmul.f32 %v2956_v32, %v2844_v34  ;;  %4442 = vtanh.f32 %v2933_v28  ;;  %v2986_v52 = vpack.c.bf16 %v2974_v35, %v2973_v22  ;;  %v2854_v56 = vmul.f32 0.5, %v5369_v17  ;;  %v5409_v17 = vld [vmem:[%s5529_s9] ss:$0 sm:$0xff] }
 0x278   : > { %4444 = vtanh.f32 %v2934_v50  ;;  %v2977_v48 = vmul.f32 %v2961_v46, %v2849_v1  ;;  %v2853_v23 = vmul.f32 0.5, %v5351_v60 }
 0x279   : > { %v4433_v25 = vpop.eup %4432  ;;  %v2985_v45 = vpack.c.bf16 %v2972_v43, %v2971_v57  ;;  %v4448_v43 = vld [vmem:[%s4736_s27 + $0x28] sm:$0x3] }
 0x27a   : > { %v4435_v55 = vpop.eup %4434  ;;  %v2962_v13 = vadd.f32 1.0, %v4433_v25 }
 0x27b   : > { %4138 = vmatprep.mubr.bf16.mxu0 %v2985_v45  ;;  %v2959_v29 = vadd.f32 1.0, %v4435_v55 }
 0x27c   : > { %4139 = vmatmul.mubr.bf16.gmra.mxu0 %v2986_v52  ;;  %v4437_v53 = vpop.eup %4436  ;;  %v2978_v40 = vmul.f32 %v2962_v13, %v2850_v63  ;;  %v4449_v52 = vld [vmem:[%s4736_s27 + $0x20] sm:$0xff]  ;;  %v4450_v63 = vld [vmem:[%s4736_s27 + $0x10] sm:$0x3] }
 0x27d   : > { %v2960_v33 = vadd.f32 1.0, %v4437_v53  ;;  %v2975_v44 = vmul.f32 %v2959_v29, %v2847_v24 }
 0x27e   : > { %v2988_v16 = vpack.c.bf16 %v2978_v40, %v2977_v48 }
 0x27f   : > { %v2976_v3 = vmul.f32 %v2960_v33, %v2848_v38  ;;  %v4439_v47 = vpop.eup %4438  ;;  %v4451_v33 = vld [vmem:[%s4736_s27 + $0x8] sm:$0xff] }
 0x280   : > { %v2963_v9 = vadd.f32 1.0, %v4439_v47 }
 0x281   : > { %v2987_v5 = vpack.c.bf16 %v2976_v3, %v2975_v44  ;;  %v4452_v3 = vld [vmem:[%s4736_s27 + $0x48] sm:$0xff] }
 0x282   : > { %v2979_v61 = vmul.f32 %v2963_v9, %v2851_v15  ;;  %v4453_v15 = vld [vmem:[%s4736_s27 + $0x30] sm:$0xff] }
 0x283   : > { %v4441_v14 = vpop.eup %4440  ;;  %4142 = vmatprep.mubr.bf16.mxu1 %v2987_v5 }
 0x284   : > { %v4443_v6 = vpop.eup %4442  ;;  %v2964_v58 = vadd.f32 1.0, %v4441_v14  ;;  %4143 = vmatmul.mubr.bf16.vlgmr.msra.gmra.mxu1 %v2988_v16 }
 0x285   : > { %v4445_v54 = vpop.eup %4444  ;;  %v2965_v18 = vadd.f32 1.0, %v4443_v6 }
 0x286   : > { %v2980_v20 = vmul.f32 %v2964_v58, %v2852_v11  ;;  %v2966_v62 = vadd.f32 1.0, %v4445_v54 }
 0x287   : > { %v2981_v10 = vmul.f32 %v2965_v18, %v2853_v23  ;;  %v4454_v18 = vld [vmem:[%s4736_s27 + $0x58] sm:$0x3] }
 0x288   : > { %v2989_v27 = vpack.c.bf16 %v2980_v20, %v2979_v61  ;;  %v2982_v7 = vmul.f32 %v2966_v62, %v2854_v56  ;;  %v4455_v62 = vld [vmem:[%s4736_s27 + $0x50] sm:$0xff] }
 0x28a   : > { %4146 = vmatprep.mubr.bf16.mxu1 %v2989_v27  ;;  %v2990_v59 = vpack.c.bf16 %v2982_v7, %v2981_v10 }
 0x28c   : > { %4147 = vmatmul.mubr.bf16.gmra.mxu1 %v2990_v59  ;;  %v4456_v59 = vld [vmem:[%s4736_s27 + $0x40] sm:$0x3] }
 0x334   : > { %v4136_v49 = vpop.f32.mrf.mxu0 }
 0x335   : > { %v3105_v60 = vadd.f32 %v4136_v49, %v5404_v41 }
 0x336   : > { %v3096_v12 = vpop.f32.mrf.mxu0 }
 0x337   : > { %v3168_v0 = vmul.f32 %v5409_v17, %v3105_v60  ;;  %v3097_v2 = vadd.f32 %v5404_v41, %v3096_v12  ;;  %v4457_v12 = vld [vmem:[%s4736_s27 + $0x38] sm:$0xff] }
 0x338   : > { %v4137_v30 = vpop.f32.mrf.mxu0 }
 0x339   : > { %v3202_v36 = vrot.slane %v3168_v0, 7  ;;  %v3166_v37 = vmul.f32 %v5409_v17, %v3097_v2  ;;  %v3108_v21 = vadd.f32 %v4137_v30, %v5404_v41 }
 0x33a   : > { %v3099_v8 = vpop.f32.mrf.mxu0 }
 0x33b   : > { %v3250_v4 = vadd.f32 %v4446_v51, %v3202_v36  ;;  %v3199_v39 = vrot.slane %v3166_v37, 7  ;;  %v3169_v26 = vmul.f32 %v5409_v17, %v3108_v21  ;;  %v3100_v28 = vadd.f32 %v5404_v41, %v3099_v8  ;;  %v4458_v21 = vld [vmem:[%s4736_s27 + $0x78] sm:$0xff] }
 0x33c   : > { %v4140_v50 = vpop.f32.mrf.mxu0 }
 0x33d   : > { %3274 = vst [vmem:[%s5420_s18 + $0xf] sm:$0xfe] %v3250_v4  ;;  %v3247_v34 = vadd.f32 %v4447_v31, %v3199_v39  ;;  %v3203_v32 = vrot.slane %v3169_v26, 7  ;;  %v3167_v19 = vmul.f32 %v5409_v17, %v3100_v28  ;;  %v3121_v42 = vadd.f32 %v4140_v50, %v5404_v41  ;;  %v4459_v28 = vld [vmem:[%s4736_s27 + $0x60] sm:$0xff] }
 0x33e   : > { %v3112_v35 = vpop.f32.mrf.mxu0 }
 0x33f   : > { %3271 = vst [vmem:[%s5420_s18 - $0x1] sm:$0xfe] %v3247_v34  ;;  %v3204_v57 = vsel %vm3198_vm10, %v3202_v36, %v3203_v32  ;;  %v3252_v22 = vadd.f32 %v4448_v43, %v3203_v32  ;;  %v3200_v25 = vrot.slane %v3167_v19, 7  ;;  %v3172_v45 = vmul.f32 %v5409_v17, %v3121_v42 }
 0x340   : > { %v3251_v55 = vadd.f32 %v4449_v52, %v3204_v57  ;;  %v3113_v13 = vadd.f32 %v5404_v41, %v3112_v35  ;;  %v4141_v29 = vpop.f32.mrf.mxu0  ;;  %v4460_v35 = vld [vmem:[%s4736_s27 + $0x88] sm:$0x3] }
 0x341   : > { %3276 = vst [vmem:[%s5420_s18 + $0x1f] sm:$0x1] %v3252_v22  ;;  %v3201_v53 = vsel %vm3198_vm10, %v3199_v39, %v3200_v25  ;;  %v3249_v46 = vadd.f32 %v4450_v63, %v3200_v25  ;;  %v3208_v24 = vrot.slane %v3172_v45, 7  ;;  %v3124_v38 = vadd.f32 %v4141_v29, %v5404_v41  ;;  %v4461_v25 = vld [vmem:[%s4736_s27 + $0x80] sm:$0xff]  ;;  %v4462_v29 = vld [vmem:[%s4736_s27 + $0x70] sm:$0x3] }
 0x342   : > { %3275 = vst [vmem:[%s5420_s18 + $0x17] sm:$0xff] %v3251_v55  ;;  %v3248_v1 = vadd.f32 %v4451_v33, %v3201_v53  ;;  %v3170_v40 = vmul.f32 %v5409_v17, %v3113_v13  ;;  %v3115_v44 = vpop.f32.mrf.mxu0 }
 0x343   : > { %3273 = vst [vmem:[%s5420_s18 + $0xf] sm:$0x1] %v3249_v46  ;;  %v3256_v47 = vadd.f32 %v4452_v3, %v3208_v24  ;;  %v3173_v48 = vmul.f32 %v5409_v17, %v3124_v38  ;;  %v3116_v5 = vadd.f32 %v5404_v41, %v3115_v44 }
 0x344   : > { %3272 = vst [vmem:[%s5420_s18 + $0x7] sm:$0xff] %v3248_v1  ;;  %v3205_v9 = vrot.slane %v3170_v40, 7  ;;  %v4144_v6 = vpop.f32.mrf.mxu1  ;;  %v4464_v40 = vld [vmem:[%s4736_s27 + $0xa8] sm:$0xff] }
 0x345   : > { %3280 = vst [vmem:[%s5420_s18 + $0x2f] sm:$0xfe] %v3256_v47  ;;  %v3209_v14 = vrot.slane %v3173_v48, 7  ;;  %v3171_v16 = vmul.f32 %v5409_v17, %v3116_v5  ;;  %v3137_v58 = vadd.f32 %v4144_v6, %v5404_v41 }
 0x346   : > { %v3253_v11 = vadd.f32 %v4453_v15, %v3205_v9  ;;  %v3128_v56 = vpop.f32.mrf.mxu1  ;;  %v4466_v15 = vld [vmem:[%s4736_s27 + $0xb8] sm:$0x3] }
 0x347   : > { %v3210_v54 = vsel %vm3198_vm10, %v3208_v24, %v3209_v14  ;;  %v3258_v61 = vadd.f32 %v4454_v18, %v3209_v14  ;;  %v3206_v20 = vrot.slane %v3171_v16, 7  ;;  %v3176_v27 = vmul.f32 %v5409_v17, %v3137_v58  ;;  %v4463_v24 = vld [vmem:[%s4736_s27 + $0x68] sm:$0xff]  ;;  %v4465_v14 = vld [vmem:[%s4736_s27 + $0x90] sm:$0xff] }
 0x348   : > { %3277 = vst [vmem:[%s5420_s18 + $0x1f] sm:$0xfe] %v3253_v11  ;;  %v3257_v23 = vadd.f32 %v4455_v62, %v3210_v54  ;;  %v3129_v7 = vadd.f32 %v5404_v41, %v3128_v56  ;;  %v4145_v60 = vpop.f32.mrf.mxu1  ;;  %v4469_v56 = vld [vmem:[%s4736_s27 + $0x98] sm:$0xff] }
 0x349   : > { %3282 = vst [vmem:[%s5420_s18 + $0x3f] sm:$0x1] %v3258_v61  ;;  %v3207_v10 = vsel %vm3198_vm10, %v3205_v9, %v3206_v20  ;;  %v3255_v49 = vadd.f32 %v4456_v59, %v3206_v20  ;;  %v3214_v2 = vrot.slane %v3176_v27, 7  ;;  %v3140_v36 = vadd.f32 %v4145_v60, %v5404_v41  ;;  %v4468_v61 = vld [vmem:[%s4736_s27 + $0xa0] sm:$0x3] }
 0x34a   : > { %3281 = vst [vmem:[%s5420_s18 + $0x37] sm:$0xff] %v3257_v23  ;;  %v3254_v0 = vadd.f32 %v4457_v12, %v3207_v10  ;;  %v3174_v30 = vmul.f32 %v5409_v17, %v3129_v7  ;;  %v3131_v37 = vpop.f32.mrf.mxu1 }
 0x34b   : > { %3279 = vst [vmem:[%s5420_s18 + $0x2f] sm:$0x1] %v3255_v49  ;;  %v3262_v8 = vadd.f32 %v4458_v21, %v3214_v2  ;;  %v3177_v4 = vmul.f32 %v5409_v17, %v3140_v36  ;;  %v3132_v39 = vadd.f32 %v5404_v41, %v3131_v37 }
 0x34c   : > { %3278 = vst [vmem:[%s5420_s18 + $0x27] sm:$0xff] %v3254_v0  ;;  %v3211_v51 = vrot.slane %v3174_v30, 7  ;;  %v4148_v26 = vpop.f32.mrf.mxu1 }
 0x34d   : > { %3286 = vst [vmem:[%s5420_s18 + $0x4f] sm:$0xfe] %v3262_v8  ;;  %v3215_v31 = vrot.slane %v3177_v4, 7  ;;  %v3175_v34 = vmul.f32 %v5409_v17, %v3132_v39  ;;  %v3153_v32 = vadd.f32 %v4148_v26, %v5404_v41 }
 0x34e   : > { %v3259_v50 = vadd.f32 %v4459_v28, %v3211_v51  ;;  %v3144_v19 = vpop.f32.mrf.mxu1 }
 0x34f   : > { %v3216_v42 = vsel %vm3198_vm10, %v3214_v2, %v3215_v31  ;;  %v3264_v57 = vadd.f32 %v4460_v35, %v3215_v31  ;;  %v3212_v43 = vrot.slane %v3175_v34, 7  ;;  %v3180_v22 = vmul.f32 %v5409_v17, %v3153_v32 }
 0x350   : > { %3283 = vst [vmem:[%s5420_s18 + $0x3f] sm:$0xfe] %v3259_v50  ;;  %v3263_v45 = vadd.f32 %v4461_v25, %v3216_v42  ;;  %v3145_v52 = vadd.f32 %v5404_v41, %v3144_v19  ;;  %v4149_v55 = vpop.f32.mrf.mxu1 }
 0x351   : > { %3288 = vst [vmem:[%s5420_s18 + $0x5f] sm:$0x1] %v3264_v57  ;;  %v3213_v13 = vsel %vm3198_vm10, %v3211_v51, %v3212_v43  ;;  %v3261_v53 = vadd.f32 %v4462_v29, %v3212_v43  ;;  %v3220_v63 = vrot.slane %v3180_v22, 7  ;;  %v3156_v46 = vadd.f32 %v4149_v55, %v5404_v41 }
 0x352   : > { %3287 = vst [vmem:[%s5420_s18 + $0x57] sm:$0xff] %v3263_v45  ;;  %v3260_v38 = vadd.f32 %v4463_v24, %v3213_v13  ;;  %v3178_v33 = vmul.f32 %v5409_v17, %v3145_v52  ;;  %v3147_v1 = vpop.f32.mrf.mxu1 }
 0x353   : > { %3285 = vst [vmem:[%s5420_s18 + $0x4f] sm:$0x1] %v3261_v53  ;;  %v3268_v44 = vadd.f32 %v4464_v40, %v3220_v63  ;;  %v3181_v3 = vmul.f32 %v5409_v17, %v3156_v46  ;;  %v3148_v47 = vadd.f32 %v5404_v41, %v3147_v1  ;;  %v4467_v41 = vld [vmem:[%s4736_s27 + $0xb0] sm:$0xff] }
 0x354   : > { %3284 = vst [vmem:[%s5420_s18 + $0x47] sm:$0xff] %v3260_v38  ;;  %v3217_v48 = vrot.slane %v3178_v33, 7 }
 0x355   : > { %3292 = vst [vmem:[%s5420_s18 + $0x6f] sm:$0xfe] %v3268_v44  ;;  %v3221_v5 = vrot.slane %v3181_v3, 7  ;;  %v3179_v9 = vmul.f32 %v5409_v17, %v3148_v47 }
 0x356   : > { %v3265_v16 = vadd.f32 %v4465_v14, %v3217_v48 }
 0x357   : > { %v3222_v6 = vsel %vm3198_vm10, %v3220_v63, %v3221_v5  ;;  %v3270_v11 = vadd.f32 %v4466_v15, %v3221_v5  ;;  %v3218_v58 = vrot.slane %v3179_v9, 7 }
 0x358   : > { %3289 = vst [vmem:[%s5420_s18 + $0x5f] sm:$0xfe] %v3265_v16  ;;  %v3269_v54 = vadd.f32 %v4467_v41, %v3222_v6 }
 0x359   : > { %3294 = vst [vmem:[%s5420_s18 + $0x7f] sm:$0x1] %v3270_v11  ;;  %v3219_v18 = vsel %vm3198_vm10, %v3217_v48, %v3218_v58  ;;  %v3267_v20 = vadd.f32 %v4468_v61, %v3218_v58 }
 0x35a   : > { %3293 = vst [vmem:[%s5420_s18 + $0x77] sm:$0xff] %v3269_v54  ;;  %v3266_v17 = vadd.f32 %v4469_v56, %v3219_v18 }
 0x35b   : > { %3291 = vst [vmem:[%s5420_s18 + $0x6f] sm:$0x1] %v3267_v20 }
 0x35c   : > { %3290 = vst [vmem:[%s5420_s18 + $0x67] sm:$0xff] %v3266_v17 }
 0x35d PF: > { %s20_s17 = sadd.s32 1, %s4508_s17   ;;  %s5580_s22 = sld [smem:[#allocation3_spill]] }
 0x35e   : > { %p17_p12 = scmp.ge.s32.totalorder %s20_s17, 6   ;;  %s5581_s12 = sld [smem:[#allocation4_spill]] }
 0x35f   : > { %s5582_s13 = smov %s4500_s15  ;;  %s5583_s14 = smov %s4504_s16 }
 0x360   :  { %19 = sbr.rel (!%p17_p12) target bundleno = 3 (0x3), region = 96 }
 0x363   : > { %s5584_s15 = smov %s5580_s22 }
 0x364   : > { %s5585_s16 = smov %s5581_s12 }

</bundles_post_ra>
